<compile_context>
chip_gen: v7x
topology: tpu7x:2x2x1
jax: 0.10.0
libtpu: 0.0.40
codegen_flags: <defaults>
</compile_context>

<pallas_src>
import math

import jax
import jax.numpy as jnp
from jax.experimental import pallas as pl
from jax.experimental.pallas import tpu as pltpu

# ----------------------------- small BERT config -----------------------------
VOCAB_SIZE = 100
TYPE_VOCAB_SIZE = 2
MAX_POSITION = 16
HIDDEN = 32
NUM_HEADS = 2
HEAD_DIM = HIDDEN // NUM_HEADS
NUM_LAYERS = 2
INTERMEDIATE = 64
NUM_LABELS = 2
LN_EPS = 1e-12
INIT_RANGE = 0.02

BATCH = 2
SEQ = 8


# ------------------------------ in-kernel helpers -----------------------------
def _layernorm(x, gamma, beta, eps=LN_EPS):
    mu = jnp.mean(x, axis=-1, keepdims=True)
    var = jnp.mean((x - mu) ** 2, axis=-1, keepdims=True)
    return (x - mu) * jax.lax.rsqrt(var + eps) * gamma + beta


def _gelu(x):
    # TODO(synk): HF default hidden_act="gelu" is the exact erf GELU; the tanh
    # approximation is used here because it maps directly to the EUP tanh.
    c = math.sqrt(2.0 / math.pi)
    return 0.5 * x * (1.0 + jnp.tanh(c * (x + 0.044715 * x * x * x)))


# ------------------------------ fused encoder kernel --------------------------
def _encoder_kernel(
    emb_ref, mask_ref, eg_ref, eb_ref,
    wqkv_ref, bqkv_ref,
    wo_ref, bo_ref, ln1g_ref, ln1b_ref,
    w1_ref, b1_ref, w2_ref, b2_ref, ln2g_ref, ln2b_ref,
    wp_ref, bp_ref, wc_ref, bc_ref,
    hid_ref, pooled_ref, logits_ref,
):
    """grid = (batch, layer). One invocation = one encoder layer for one batch row."""
    layer = pl.program_id(1)

    # ---- prologue: embedding LayerNorm, only on the first layer step ----
    @pl.when(layer == 0)
    def _():
        hid_ref[...] = _layernorm(emb_ref[...], eg_ref[...], eb_ref[...])

    x = hid_ref[...]                                     # (S, H), VMEM-resident

    # ---- self-attention: fused QKV projection (one wide MXU pass) ----
    qkv = (jnp.dot(x, wqkv_ref[...], preferred_element_type=jnp.float32)
           + bqkv_ref[...])                              # (S, 3H)

    def heads(base):  # -> (NH, S, HD): heads become a leading batch axis
        return jnp.stack(
            [qkv[:, base + h * HEAD_DIM: base + (h + 1) * HEAD_DIM]
             for h in range(NUM_HEADS)],
            axis=0)

    qh = heads(0)
    kh = heads(HIDDEN)
    vh = heads(2 * HIDDEN)

    # all heads in one batched einsum; mask pre-expanded to (NH, S, S) outside
    scale = 1.0 / math.sqrt(HEAD_DIM)
    scores = jnp.einsum('hqd,hkd->hqk', qh, kh,
                        preferred_element_type=jnp.float32) * scale
    scores = scores + mask_ref[...]
    scores = scores - jnp.max(scores, axis=-1, keepdims=True)
    p = jnp.exp(scores)
    p = p * pl.reciprocal(jnp.sum(p, axis=-1, keepdims=True), approx=True)
    ctx = jnp.einsum('hqk,hkd->hqd', p, vh,
                     preferred_element_type=jnp.float32)         # (NH, S, HD)

    # single output projection: sum_h ctx[h] @ Wo[h]  ==  concat_h(ctx) @ Wo
    attn = bo_ref[...]                                            # (1, H)
    for h in range(NUM_HEADS):
        attn = attn + jnp.dot(ctx[h], wo_ref[h],
                              preferred_element_type=jnp.float32)

    h1 = _layernorm(attn + x, ln1g_ref[...], ln1b_ref[...])       # (S, H)

    # ---- feed-forward ----
    ff = jnp.dot(h1, w1_ref[...], preferred_element_type=jnp.float32) + b1_ref[...]
    ff = _gelu(ff)
    ff = jnp.dot(ff, w2_ref[...], preferred_element_type=jnp.float32) + b2_ref[...]

    h2 = _layernorm(ff + h1, ln2g_ref[...], ln2b_ref[...])
    hid_ref[...] = h2                                             # stays in VMEM

    # ---- epilogue: pooler (tanh) + classifier on the last layer step ----
    @pl.when(layer == pl.num_programs(1) - 1)
    def _():
        first = h2[0:1, :]                                        # CLS token (1, H)
        pooled = jnp.tanh(
            jnp.dot(first, wp_ref[...], preferred_element_type=jnp.float32)
            + bp_ref[...])
        pooled_ref[...] = pooled
        logits_ref[...] = (
            jnp.dot(pooled, wc_ref[...], preferred_element_type=jnp.float32)
            + bc_ref[...])


# ------------------------------ kernel wrapper --------------------------------
def bert_encoder_fused(params, emb, add_mask_heads):
    """emb: (B, S, H) summed embeddings; add_mask_heads: (B, NH, S, S) additive mask."""
    B, S, H = emb.shape
    L = NUM_LAYERS

    def bspec(shape):   # batch-indexed (leading B dim squeezed)
        return pl.BlockSpec((None,) + shape, lambda b, l, _s=len(shape): (b,) + (0,) * _s)

    def lspec(shape):   # layer-indexed (leading L dim squeezed)
        return pl.BlockSpec((None,) + shape, lambda b, l, _s=len(shape): (l,) + (0,) * _s)

    def fspec(shape):   # replicated full array
        return pl.BlockSpec(shape, lambda b, l, _s=len(shape): (0,) * _s)

    in_specs = [
        bspec((S, H)),                                # emb
        bspec((NUM_HEADS, S, S)),                     # additive mask (per head)
        fspec((1, H)), fspec((1, H)),                 # embedding LayerNorm
        lspec((H, 3 * H)), lspec((1, 3 * H)),         # fused wqkv, bqkv
        lspec((NUM_HEADS, HEAD_DIM, H)), lspec((1, H)),   # wo (head-split), bo
        lspec((1, H)), lspec((1, H)),                 # ln1 gamma/beta
        lspec((H, INTERMEDIATE)), lspec((1, INTERMEDIATE)),   # ffn1
        lspec((INTERMEDIATE, H)), lspec((1, H)),      # ffn2
        lspec((1, H)), lspec((1, H)),                 # ln2 gamma/beta
        fspec((H, H)), fspec((1, H)),                 # pooler
        fspec((H, NUM_LABELS)), fspec((1, NUM_LABELS)),   # classifier
    ]
    out_specs = (bspec((S, H)), bspec((1, H)), bspec((1, NUM_LABELS)))
    out_shape = (jax.ShapeDtypeStruct((B, S, H), jnp.float32),
                 jax.ShapeDtypeStruct((B, 1, H), jnp.float32),
                 jax.ShapeDtypeStruct((B, 1, NUM_LABELS), jnp.float32))

    # one-off metadata moves outside the kernel:
    #   * Q/K/V weights fused along the output dim -> single wide matmul
    #   * Wo pre-split by head -> head-blocked output projection (no concat)
    wqkv = jnp.concatenate([params['wq'], params['wk'], params['wv']], axis=-1)  # (L, H, 3H)
    bqkv = jnp.concatenate([params['bq'], params['bk'], params['bv']], axis=-1)  # (L, 1, 3H)
    wo_heads = params['wo'].reshape(L, NUM_HEADS, HEAD_DIM, H)

    hidden, pooled, logits = pl.pallas_call(
        _encoder_kernel,
        grid=(B, L),
        in_specs=in_specs,
        out_specs=out_specs,
        out_shape=out_shape,
        compiler_params=pltpu.CompilerParams(
            dimension_semantics=("parallel", "arbitrary")),
    )(emb, add_mask_heads,
      params['emb_ln_g'], params['emb_ln_b'],
      wqkv, bqkv, wo_heads, params['bo'],
      params['ln1_g'], params['ln1_b'],
      params['w_ff1'], params['b_ff1'], params['w_ff2'], params['b_ff2'],
      params['ln2_g'], params['ln2_b'],
      params['pooler_w'], params['pooler_b'],
      params['cls_w'], params['cls_b'])

    return hidden, pooled[:, 0, :], logits[:, 0, :]


# ------------------------------ parameter init ---------------------------------
def init_params(key):
    def normal(key, shape):
        return INIT_RANGE * jax.random.normal(key, shape, dtype=jnp.float32)

    keys = iter(jax.random.split(key, 32))
    L, H, I = NUM_LAYERS, HIDDEN, INTERMEDIATE
    params = {
        'word_emb': normal(next(keys), (VOCAB_SIZE, H)),
        'pos_emb': normal(next(keys), (MAX_POSITION, H)),
        'type_emb': normal(next(keys), (TYPE_VOCAB_SIZE, H)),
        'emb_ln_g': jnp.ones((1, H), jnp.float32),
        'emb_ln_b': jnp.zeros((1, H), jnp.float32),
        # per-layer weights stacked along a leading layer axis
        'wq': normal(next(keys), (L, H, H)), 'bq': jnp.zeros((L, 1, H), jnp.float32),
        'wk': normal(next(keys), (L, H, H)), 'bk': jnp.zeros((L, 1, H), jnp.float32),
        'wv': normal(next(keys), (L, H, H)), 'bv': jnp.zeros((L, 1, H), jnp.float32),
        'wo': normal(next(keys), (L, H, H)), 'bo': jnp.zeros((L, 1, H), jnp.float32),
        'ln1_g': jnp.ones((L, 1, H), jnp.float32),
        'ln1_b': jnp.zeros((L, 1, H), jnp.float32),
        'w_ff1': normal(next(keys), (L, H, I)),
        'b_ff1': jnp.zeros((L, 1, I), jnp.float32),
        'w_ff2': normal(next(keys), (L, I, H)),
        'b_ff2': jnp.zeros((L, 1, H), jnp.float32),
        'ln2_g': jnp.ones((L, 1, H), jnp.float32),
        'ln2_b': jnp.zeros((L, 1, H), jnp.float32),
        'pooler_w': normal(next(keys), (H, H)),
        'pooler_b': jnp.zeros((1, H), jnp.float32),
        'cls_w': normal(next(keys), (H, NUM_LABELS)),
        'cls_b': jnp.zeros((1, NUM_LABELS), jnp.float32),
    }
    return params


# ------------------------------ forward pass ------------------------------------
def bert_for_sequence_classification(params, input_ids, attention_mask=None,
                                      token_type_ids=None, position_ids=None,
                                      labels=None):
    B, S = input_ids.shape
    if attention_mask is None:
        attention_mask = jnp.ones((B, S), jnp.float32)
    if token_type_ids is None:
        token_type_ids = jnp.zeros((B, S), jnp.int32)
    if position_ids is None:
        position_ids = jnp.broadcast_to(jnp.arange(S, dtype=jnp.int32), (B, S))

    # ---- embeddings (gathers are glue; everything after runs in one kernel) ----
    emb = (jnp.take(params['word_emb'], input_ids, axis=0)
           + jnp.take(params['pos_emb'], position_ids, axis=0)
           + jnp.take(params['type_emb'], token_type_ids, axis=0))    # (B, S, H)

    # additive mask, pre-expanded to (B, NH, S, S) so the kernel never broadcasts
    add_mask = (1.0 - attention_mask.astype(jnp.float32)) * -10000.0  # (B, S)
    add_mask = jnp.broadcast_to(add_mask[:, None, None, :],
                                (B, NUM_HEADS, S, S))

    hidden, pooled, logits = bert_encoder_fused(params, emb, add_mask)

    loss = None
    if labels is not None:
        if NUM_LABELS == 1:
            loss = jnp.mean((logits.reshape(-1) - labels.reshape(-1)) ** 2)
        else:
            logp = jax.nn.log_softmax(logits.reshape(-1, NUM_LABELS), axis=-1)
            loss = -jnp.mean(
                jnp.take_along_axis(logp, labels.reshape(-1, 1), axis=-1))

    # TODO(synk): output_hidden_states / output_attentions / head_mask paths are
    # not materialized (defaults: None), matching the default config.
    return {'loss': loss, 'logits': logits, 'pooler_output': pooled,
            'last_hidden_state': hidden, 'hidden_states': None,
            'attentions': None}


# ------------------------------------ main ---------------------------------------
if __name__ == "__main__":
    key = jax.random.PRNGKey(0)
    pkey, ikey, lkey = jax.random.split(key, 3)

    params = init_params(pkey)

    input_ids = jax.random.randint(ikey, (BATCH, SEQ), 0, VOCAB_SIZE, dtype=jnp.int32)
    attention_mask = jnp.ones((BATCH, SEQ), jnp.float32).at[1, SEQ - 2:].set(0.0)
    token_type_ids = jnp.zeros((BATCH, SEQ), jnp.int32)
    labels = jax.random.randint(lkey, (BATCH,), 0, NUM_LABELS, dtype=jnp.int32)

    out = bert_for_sequence_classification(
        params, input_ids, attention_mask=attention_mask,
        token_type_ids=token_type_ids, labels=labels)

    jax.block_until_ready(out['logits'])
    jax.block_until_ready(out['loss'])
    assert out['logits'].shape == (BATCH, NUM_LABELS)
    assert out['pooler_output'].shape == (BATCH, HIDDEN)
    assert out['last_hidden_state'].shape == (BATCH, SEQ, HIDDEN)
    assert out['loss'].shape == ()
    assert bool(jnp.all(jnp.isfinite(out['logits'])))
    print("KERNEL_OK")
</pallas_src>

<mosaic_0001>
module attributes {stable_mosaic.version = 11 : i64} {
  func.func @_encoder_kernel(%arg0: i32, %arg1: i32, %arg2: memref<1x8x32xf32, #tpu.memory_space<vmem>>, %arg3: memref<1x2x8x8xf32, #tpu.memory_space<vmem>>, %arg4: memref<1x32xf32, #tpu.memory_space<vmem>>, %arg5: memref<1x32xf32, #tpu.memory_space<vmem>>, %arg6: memref<1x32x96xf32, #tpu.memory_space<vmem>>, %arg7: memref<1x1x96xf32, #tpu.memory_space<vmem>>, %arg8: memref<1x2x16x32xf32, #tpu.memory_space<vmem>>, %arg9: memref<1x1x32xf32, #tpu.memory_space<vmem>>, %arg10: memref<1x1x32xf32, #tpu.memory_space<vmem>>, %arg11: memref<1x1x32xf32, #tpu.memory_space<vmem>>, %arg12: memref<1x32x64xf32, #tpu.memory_space<vmem>>, %arg13: memref<1x1x64xf32, #tpu.memory_space<vmem>>, %arg14: memref<1x64x32xf32, #tpu.memory_space<vmem>>, %arg15: memref<1x1x32xf32, #tpu.memory_space<vmem>>, %arg16: memref<1x1x32xf32, #tpu.memory_space<vmem>>, %arg17: memref<1x1x32xf32, #tpu.memory_space<vmem>>, %arg18: memref<32x32xf32, #tpu.memory_space<vmem>>, %arg19: memref<1x32xf32, #tpu.memory_space<vmem>>, %arg20: memref<32x2xf32, #tpu.memory_space<vmem>>, %arg21: memref<1x2xf32, #tpu.memory_space<vmem>>, %arg22: memref<1x8x32xf32, #tpu.memory_space<vmem>>, %arg23: memref<1x1x32xf32, #tpu.memory_space<vmem>>, %arg24: memref<1x1x2xf32, #tpu.memory_space<vmem>>) attributes {dimension_semantics = [#tpu.dimension_semantics<parallel>, #tpu.dimension_semantics<arbitrary>], iteration_bounds = array<i64: 2, 2>, scalar_prefetch = 0 : i64, scratch_operands = 0 : i64, tpu.core_type = #tpu.core_type<tc>, window_params = [{transform_indices = @transform_0, window_bounds = array<i64: 1, 8, 32>}, {transform_indices = @transform_1, window_bounds = array<i64: 1, 2, 8, 8>}, {pipeline_mode = #tpu.pipeline_mode<synchronous>, transform_indices = @transform_2, window_bounds = array<i64: 1, 32>}, {pipeline_mode = #tpu.pipeline_mode<synchronous>, transform_indices = @transform_3, window_bounds = array<i64: 1, 32>}, {transform_indices = @transform_4, window_bounds = array<i64: 1, 32, 96>}, {transform_indices = @transform_5, window_bounds = array<i64: 1, 1, 96>}, {transform_indices = @transform_6, window_bounds = array<i64: 1, 2, 16, 32>}, {transform_indices = @transform_7, window_bounds = array<i64: 1, 1, 32>}, {transform_indices = @transform_8, window_bounds = array<i64: 1, 1, 32>}, {transform_indices = @transform_9, window_bounds = array<i64: 1, 1, 32>}, {transform_indices = @transform_10, window_bounds = array<i64: 1, 32, 64>}, {transform_indices = @transform_11, window_bounds = array<i64: 1, 1, 64>}, {transform_indices = @transform_12, window_bounds = array<i64: 1, 64, 32>}, {transform_indices = @transform_13, window_bounds = array<i64: 1, 1, 32>}, {transform_indices = @transform_14, window_bounds = array<i64: 1, 1, 32>}, {transform_indices = @transform_15, window_bounds = array<i64: 1, 1, 32>}, {pipeline_mode = #tpu.pipeline_mode<synchronous>, transform_indices = @transform_16, window_bounds = array<i64: 32, 32>}, {pipeline_mode = #tpu.pipeline_mode<synchronous>, transform_indices = @transform_17, window_bounds = array<i64: 1, 32>}, {pipeline_mode = #tpu.pipeline_mode<synchronous>, transform_indices = @transform_18, window_bounds = array<i64: 32, 2>}, {pipeline_mode = #tpu.pipeline_mode<synchronous>, transform_indices = @transform_19, window_bounds = array<i64: 1, 2>}, {transform_indices = @transform_20, window_bounds = array<i64: 1, 8, 32>}, {transform_indices = @transform_21, window_bounds = array<i64: 1, 1, 32>}, {transform_indices = @transform_22, window_bounds = array<i64: 1, 1, 2>}]} {
    %c0_i32 = arith.constant 0 : i32
    %0 = arith.cmpi eq, %arg1, %c0_i32 : i32
    %1 = arith.extui %0 : i1 to i32
    %c0_i32_0 = arith.constant 0 : i32
    %2 = arith.cmpi ne, %1, %c0_i32_0 : i32
    scf.if %2 {
      %c0_74 = arith.constant 0 : index
      %c0_75 = arith.constant 0 : index
      %c0_76 = arith.constant 0 : index
      %146 = vector.load %arg2[%c0_74, %c0_75, %c0_76] : memref<1x8x32xf32, #tpu.memory_space<vmem>>, vector<1x8x32xf32>
      %147 = vector.shape_cast %146 : vector<1x8x32xf32> to vector<8x32xf32>
      %c0_77 = arith.constant 0 : index
      %c0_78 = arith.constant 0 : index
      %148 = vector.load %arg4[%c0_77, %c0_78] : memref<1x32xf32, #tpu.memory_space<vmem>>, vector<1x32xf32>
      %c0_79 = arith.constant 0 : index
      %c0_80 = arith.constant 0 : index
      %149 = vector.load %arg5[%c0_79, %c0_80] : memref<1x32xf32, #tpu.memory_space<vmem>>, vector<1x32xf32>
      %cst_81 = arith.constant dense<0.000000e+00> : vector<8xf32>
      %150 = vector.multi_reduction <add>, %147, %cst_81 [1] : vector<8x32xf32> to vector<8xf32>
      %151 = vector.shape_cast %150 : vector<8xf32> to vector<8x1xf32>
      %cst_82 = arith.constant 3.200000e+01 : f32
      %152 = vector.broadcast %cst_82 : f32 to vector<8x1xf32>
      %153 = arith.divf %151, %152 : vector<8x1xf32>
      %154 = vector.broadcast %153 : vector<8x1xf32> to vector<8x32xf32>
      %155 = arith.subf %147, %154 : vector<8x32xf32>
      %156 = arith.mulf %155, %155 : vector<8x32xf32>
      %cst_83 = arith.constant dense<0.000000e+00> : vector<8xf32>
      %157 = vector.multi_reduction <add>, %156, %cst_83 [1] : vector<8x32xf32> to vector<8xf32>
      %158 = vector.shape_cast %157 : vector<8xf32> to vector<8x1xf32>
      %cst_84 = arith.constant 3.200000e+01 : f32
      %159 = vector.broadcast %cst_84 : f32 to vector<8x1xf32>
      %160 = arith.divf %158, %159 : vector<8x1xf32>
      %161 = vector.broadcast %153 : vector<8x1xf32> to vector<8x32xf32>
      %162 = arith.subf %147, %161 : vector<8x32xf32>
      %cst_85 = arith.constant 9.99999996E-13 : f32
      %163 = vector.broadcast %cst_85 : f32 to vector<8x1xf32>
      %164 = arith.addf %160, %163 : vector<8x1xf32>
      %165 = math.rsqrt %164 : vector<8x1xf32>
      %166 = vector.broadcast %165 : vector<8x1xf32> to vector<8x32xf32>
      %167 = arith.mulf %162, %166 : vector<8x32xf32>
      %168 = vector.broadcast %148 : vector<1x32xf32> to vector<8x32xf32>
      %169 = arith.mulf %167, %168 : vector<8x32xf32>
      %170 = vector.broadcast %149 : vector<1x32xf32> to vector<8x32xf32>
      %171 = arith.addf %169, %170 : vector<8x32xf32>
      %c0_86 = arith.constant 0 : index
      %c0_87 = arith.constant 0 : index
      %c0_88 = arith.constant 0 : index
      %172 = vector.load %arg22[%c0_86, %c0_87, %c0_88] : memref<1x8x32xf32, #tpu.memory_space<vmem>>, vector<1x8x32xf32>
      %173 = vector.shape_cast %172 : vector<1x8x32xf32> to vector<8x32xf32>
      %174 = vector.shape_cast %171 : vector<8x32xf32> to vector<1x8x32xf32>
      tpu.vector_store %arg22[%c0_86, %c0_87, %c0_88], %174 {strides = array<i32>} : memref<1x8x32xf32, #tpu.memory_space<vmem>>, vector<1x8x32xf32>,
    } else {
    }
    %c0 = arith.constant 0 : index
    %c0_1 = arith.constant 0 : index
    %c0_2 = arith.constant 0 : index
    %3 = vector.load %arg22[%c0, %c0_1, %c0_2] : memref<1x8x32xf32, #tpu.memory_space<vmem>>, vector<1x8x32xf32>
    %4 = vector.shape_cast %3 : vector<1x8x32xf32> to vector<8x32xf32>
    %c0_3 = arith.constant 0 : index
    %c0_4 = arith.constant 0 : index
    %c0_5 = arith.constant 0 : index
    %5 = vector.load %arg6[%c0_3, %c0_4, %c0_5] : memref<1x32x96xf32, #tpu.memory_space<vmem>>, vector<1x32x96xf32>
    %6 = vector.shape_cast %5 : vector<1x32x96xf32> to vector<32x96xf32>
    %cst = arith.constant dense<0.000000e+00> : vector<8x96xf32>
    %7 = tpu.matmul %4, %6, %cst {dimension_numbers = #tpu.dot_dimension_numbers<[1], [0], [0], [1], [0, 0, 1, 1], [], []>} : vector<8x32xf32>, vector<32x96xf32>, vector<8x96xf32> -> vector<8x96xf32>
    %c0_6 = arith.constant 0 : index
    %c0_7 = arith.constant 0 : index
    %c0_8 = arith.constant 0 : index
    %8 = vector.load %arg7[%c0_6, %c0_7, %c0_8] : memref<1x1x96xf32, #tpu.memory_space<vmem>>, vector<1x1x96xf32>
    %9 = vector.shape_cast %8 : vector<1x1x96xf32> to vector<1x96xf32>
    %10 = vector.broadcast %9 : vector<1x96xf32> to vector<8x96xf32>
    %11 = arith.addf %7, %10 : vector<8x96xf32>
    %12 = vector.extract_strided_slice %11 {offsets = [0, 0], sizes = [8, 16], strides = [1, 1]} : vector<8x96xf32> to vector<8x16xf32>
    %13 = vector.extract_strided_slice %11 {offsets = [0, 16], sizes = [8, 16], strides = [1, 1]} : vector<8x96xf32> to vector<8x16xf32>
    %14 = vector.shape_cast %12 : vector<8x16xf32> to vector<1x8x16xf32>
    %15 = vector.shape_cast %13 : vector<8x16xf32> to vector<1x8x16xf32>
    %16 = tpu.concatenate %14, %15 in 0 : vector<1x8x16xf32>, vector<1x8x16xf32> -> vector<2x8x16xf32>
    %17 = vector.extract_strided_slice %11 {offsets = [0, 32], sizes = [8, 16], strides = [1, 1]} : vector<8x96xf32> to vector<8x16xf32>
    %18 = vector.extract_strided_slice %11 {offsets = [0, 48], sizes = [8, 16], strides = [1, 1]} : vector<8x96xf32> to vector<8x16xf32>
    %19 = vector.shape_cast %17 : vector<8x16xf32> to vector<1x8x16xf32>
    %20 = vector.shape_cast %18 : vector<8x16xf32> to vector<1x8x16xf32>
    %21 = tpu.concatenate %19, %20 in 0 : vector<1x8x16xf32>, vector<1x8x16xf32> -> vector<2x8x16xf32>
    %22 = vector.extract_strided_slice %11 {offsets = [0, 64], sizes = [8, 16], strides = [1, 1]} : vector<8x96xf32> to vector<8x16xf32>
    %23 = vector.extract_strided_slice %11 {offsets = [0, 80], sizes = [8, 16], strides = [1, 1]} : vector<8x96xf32> to vector<8x16xf32>
    %24 = vector.shape_cast %22 : vector<8x16xf32> to vector<1x8x16xf32>
    %25 = vector.shape_cast %23 : vector<8x16xf32> to vector<1x8x16xf32>
    %26 = tpu.concatenate %24, %25 in 0 : vector<1x8x16xf32>, vector<1x8x16xf32> -> vector<2x8x16xf32>
    "tpu.trace_start"() <{level = 10 : i32, message = "hqd,hkd->hqk"}> : () -> ()
    %cst_9 = arith.constant dense<0.000000e+00> : vector<2x8x8xf32>
    %27 = tpu.matmul %16, %21, %cst_9 {dimension_numbers = #tpu.dot_dimension_numbers<[2], [2], [1], [1], [0, 0, 0, 1, 1, 1], [0], [0]>} : vector<2x8x16xf32>, vector<2x8x16xf32>, vector<2x8x8xf32> -> vector<2x8x8xf32>
    "tpu.trace_stop"() : () -> ()
    %cst_10 = arith.constant 2.500000e-01 : f32
    %28 = vector.broadcast %cst_10 : f32 to vector<2x8x8xf32>
    %29 = arith.mulf %27, %28 : vector<2x8x8xf32>
    %c0_11 = arith.constant 0 : index
    %c0_12 = arith.constant 0 : index
    %c0_13 = arith.constant 0 : index
    %c0_14 = arith.constant 0 : index
    %30 = vector.load %arg3[%c0_11, %c0_12, %c0_13, %c0_14] : memref<1x2x8x8xf32, #tpu.memory_space<vmem>>, vector<1x2x8x8xf32>
    %31 = vector.shape_cast %30 : vector<1x2x8x8xf32> to vector<2x8x8xf32>
    %32 = arith.addf %29, %31 : vector<2x8x8xf32>
    %cst_15 = arith.constant dense<0xFF800000> : vector<2x8xf32>
    %33 = vector.multi_reduction <maximumf>, %32, %cst_15 [2] : vector<2x8x8xf32> to vector<2x8xf32>
    %34 = vector.shape_cast %33 : vector<2x8xf32> to vector<2x8x1xf32>
    %35 = vector.broadcast %34 : vector<2x8x1xf32> to vector<2x8x8xf32>
    %36 = arith.subf %32, %35 : vector<2x8x8xf32>
    %37 = math.exp %36 : vector<2x8x8xf32>
    %cst_16 = arith.constant dense<0.000000e+00> : vector<2x8xf32>
    %38 = vector.multi_reduction <add>, %37, %cst_16 [2] : vector<2x8x8xf32> to vector<2x8xf32>
    %39 = vector.shape_cast %38 : vector<2x8xf32> to vector<2x8x1xf32>
    %40 = tpu.reciprocal %39 {approx = true} : vector<2x8x1xf32> -> vector<2x8x1xf32>
    %41 = vector.broadcast %40 : vector<2x8x1xf32> to vector<2x8x8xf32>
    %42 = arith.mulf %37, %41 : vector<2x8x8xf32>
    "tpu.trace_start"() <{level = 10 : i32, message = "hqk,hkd->hqd"}> : () -> ()
    %cst_17 = arith.constant dense<0.000000e+00> : vector<2x8x16xf32>
    %43 = tpu.matmul %42, %26, %cst_17 {dimension_numbers = #tpu.dot_dimension_numbers<[2], [1], [1], [2], [0, 0, 0, 1, 1, 2], [0], [0]>} : vector<2x8x8xf32>, vector<2x8x16xf32>, vector<2x8x16xf32> -> vector<2x8x16xf32>
    "tpu.trace_stop"() : () -> ()
    %c0_18 = arith.constant 0 : index
    %c0_19 = arith.constant 0 : index
    %c0_20 = arith.constant 0 : index
    %44 = vector.load %arg9[%c0_18, %c0_19, %c0_20] : memref<1x1x32xf32, #tpu.memory_space<vmem>>, vector<1x1x32xf32>
    %45 = vector.shape_cast %44 : vector<1x1x32xf32> to vector<1x32xf32>
    %46 = vector.extract_strided_slice %43 {offsets = [0, 0, 0], sizes = [1, 8, 16], strides = [1, 1, 1]} : vector<2x8x16xf32> to vector<1x8x16xf32>
    %47 = vector.shape_cast %46 : vector<1x8x16xf32> to vector<8x16xf32>
    %c0_21 = arith.constant 0 : index
    %c0_22 = arith.constant 0 : index
    %c0_23 = arith.constant 0 : index
    %c0_24 = arith.constant 0 : index
    %48 = vector.load %arg8[%c0_21, %c0_22, %c0_23, %c0_24] : memref<1x2x16x32xf32, #tpu.memory_space<vmem>>, vector<1x1x16x32xf32>
    %49 = vector.shape_cast %48 : vector<1x1x16x32xf32> to vector<16x32xf32>
    %cst_25 = arith.constant dense<0.000000e+00> : vector<8x32xf32>
    %50 = tpu.matmul %47, %49, %cst_25 {dimension_numbers = #tpu.dot_dimension_numbers<[1], [0], [0], [1], [0, 0, 1, 1], [], []>} : vector<8x16xf32>, vector<16x32xf32>, vector<8x32xf32> -> vector<8x32xf32>
    %51 = vector.broadcast %45 : vector<1x32xf32> to vector<8x32xf32>
    %52 = arith.addf %51, %50 : vector<8x32xf32>
    %53 = vector.extract_strided_slice %43 {offsets = [1, 0, 0], sizes = [1, 8, 16], strides = [1, 1, 1]} : vector<2x8x16xf32> to vector<1x8x16xf32>
    %54 = vector.shape_cast %53 : vector<1x8x16xf32> to vector<8x16xf32>
    %c0_26 = arith.constant 0 : index
    %c1 = arith.constant 1 : index
    %c0_27 = arith.constant 0 : index
    %c0_28 = arith.constant 0 : index
    %55 = vector.load %arg8[%c0_26, %c1, %c0_27, %c0_28] : memref<1x2x16x32xf32, #tpu.memory_space<vmem>>, vector<1x1x16x32xf32>
    %56 = vector.shape_cast %55 : vector<1x1x16x32xf32> to vector<16x32xf32>
    %cst_29 = arith.constant dense<0.000000e+00> : vector<8x32xf32>
    %57 = tpu.matmul %54, %56, %cst_29 {dimension_numbers = #tpu.dot_dimension_numbers<[1], [0], [0], [1], [0, 0, 1, 1], [], []>} : vector<8x16xf32>, vector<16x32xf32>, vector<8x32xf32> -> vector<8x32xf32>
    %58 = arith.addf %52, %57 : vector<8x32xf32>
    %59 = arith.addf %58, %4 : vector<8x32xf32>
    %c0_30 = arith.constant 0 : index
    %c0_31 = arith.constant 0 : index
    %c0_32 = arith.constant 0 : index
    %60 = vector.load %arg10[%c0_30, %c0_31, %c0_32] : memref<1x1x32xf32, #tpu.memory_space<vmem>>, vector<1x1x32xf32>
    %61 = vector.shape_cast %60 : vector<1x1x32xf32> to vector<1x32xf32>
    %c0_33 = arith.constant 0 : index
    %c0_34 = arith.constant 0 : index
    %c0_35 = arith.constant 0 : index
    %62 = vector.load %arg11[%c0_33, %c0_34, %c0_35] : memref<1x1x32xf32, #tpu.memory_space<vmem>>, vector<1x1x32xf32>
    %63 = vector.shape_cast %62 : vector<1x1x32xf32> to vector<1x32xf32>
    %cst_36 = arith.constant dense<0.000000e+00> : vector<8xf32>
    %64 = vector.multi_reduction <add>, %59, %cst_36 [1] : vector<8x32xf32> to vector<8xf32>
    %65 = vector.shape_cast %64 : vector<8xf32> to vector<8x1xf32>
    %cst_37 = arith.constant 3.200000e+01 : f32
    %66 = vector.broadcast %cst_37 : f32 to vector<8x1xf32>
    %67 = arith.divf %65, %66 : vector<8x1xf32>
    %68 = vector.broadcast %67 : vector<8x1xf32> to vector<8x32xf32>
    %69 = arith.subf %59, %68 : vector<8x32xf32>
    %70 = arith.mulf %69, %69 : vector<8x32xf32>
    %cst_38 = arith.constant dense<0.000000e+00> : vector<8xf32>
    %71 = vector.multi_reduction <add>, %70, %cst_38 [1] : vector<8x32xf32> to vector<8xf32>
    %72 = vector.shape_cast %71 : vector<8xf32> to vector<8x1xf32>
    %cst_39 = arith.constant 3.200000e+01 : f32
    %73 = vector.broadcast %cst_39 : f32 to vector<8x1xf32>
    %74 = arith.divf %72, %73 : vector<8x1xf32>
    %75 = vector.broadcast %67 : vector<8x1xf32> to vector<8x32xf32>
    %76 = arith.subf %59, %75 : vector<8x32xf32>
    %cst_40 = arith.constant 9.99999996E-13 : f32
    %77 = vector.broadcast %cst_40 : f32 to vector<8x1xf32>
    %78 = arith.addf %74, %77 : vector<8x1xf32>
    %79 = math.rsqrt %78 : vector<8x1xf32>
    %80 = vector.broadcast %79 : vector<8x1xf32> to vector<8x32xf32>
    %81 = arith.mulf %76, %80 : vector<8x32xf32>
    %82 = vector.broadcast %61 : vector<1x32xf32> to vector<8x32xf32>
    %83 = arith.mulf %81, %82 : vector<8x32xf32>
    %84 = vector.broadcast %63 : vector<1x32xf32> to vector<8x32xf32>
    %85 = arith.addf %83, %84 : vector<8x32xf32>
    %c0_41 = arith.constant 0 : index
    %c0_42 = arith.constant 0 : index
    %c0_43 = arith.constant 0 : index
    %86 = vector.load %arg12[%c0_41, %c0_42, %c0_43] : memref<1x32x64xf32, #tpu.memory_space<vmem>>, vector<1x32x64xf32>
    %87 = vector.shape_cast %86 : vector<1x32x64xf32> to vector<32x64xf32>
    %cst_44 = arith.constant dense<0.000000e+00> : vector<8x64xf32>
    %88 = tpu.matmul %85, %87, %cst_44 {dimension_numbers = #tpu.dot_dimension_numbers<[1], [0], [0], [1], [0, 0, 1, 1], [], []>} : vector<8x32xf32>, vector<32x64xf32>, vector<8x64xf32> -> vector<8x64xf32>
    %c0_45 = arith.constant 0 : index
    %c0_46 = arith.constant 0 : index
    %c0_47 = arith.constant 0 : index
    %89 = vector.load %arg13[%c0_45, %c0_46, %c0_47] : memref<1x1x64xf32, #tpu.memory_space<vmem>>, vector<1x1x64xf32>
    %90 = vector.shape_cast %89 : vector<1x1x64xf32> to vector<1x64xf32>
    %91 = vector.broadcast %90 : vector<1x64xf32> to vector<8x64xf32>
    %92 = arith.addf %88, %91 : vector<8x64xf32>
    %cst_48 = arith.constant 5.000000e-01 : f32
    %93 = vector.broadcast %cst_48 : f32 to vector<8x64xf32>
    %94 = arith.mulf %93, %92 : vector<8x64xf32>
    %cst_49 = arith.constant 4.471500e-02 : f32
    %95 = vector.broadcast %cst_49 : f32 to vector<8x64xf32>
    %96 = arith.mulf %95, %92 : vector<8x64xf32>
    %97 = arith.mulf %96, %92 : vector<8x64xf32>
    %98 = arith.mulf %97, %92 : vector<8x64xf32>
    %99 = arith.addf %92, %98 : vector<8x64xf32>
    %cst_50 = arith.constant 0.797884583 : f32
    %100 = vector.broadcast %cst_50 : f32 to vector<8x64xf32>
    %101 = arith.mulf %100, %99 : vector<8x64xf32>
    %102 = math.tanh %101 : vector<8x64xf32>
    %cst_51 = arith.constant 1.000000e+00 : f32
    %103 = vector.broadcast %cst_51 : f32 to vector<8x64xf32>
    %104 = arith.addf %103, %102 : vector<8x64xf32>
    %105 = arith.mulf %94, %104 : vector<8x64xf32>
    %c0_52 = arith.constant 0 : index
    %c0_53 = arith.constant 0 : index
    %c0_54 = arith.constant 0 : index
    %106 = vector.load %arg14[%c0_52, %c0_53, %c0_54] : memref<1x64x32xf32, #tpu.memory_space<vmem>>, vector<1x64x32xf32>
    %107 = vector.shape_cast %106 : vector<1x64x32xf32> to vector<64x32xf32>
    %cst_55 = arith.constant dense<0.000000e+00> : vector<8x32xf32>
    %108 = tpu.matmul %105, %107, %cst_55 {dimension_numbers = #tpu.dot_dimension_numbers<[1], [0], [0], [1], [0, 0, 1, 1], [], []>} : vector<8x64xf32>, vector<64x32xf32>, vector<8x32xf32> -> vector<8x32xf32>
    %c0_56 = arith.constant 0 : index
    %c0_57 = arith.constant 0 : index
    %c0_58 = arith.constant 0 : index
    %109 = vector.load %arg15[%c0_56, %c0_57, %c0_58] : memref<1x1x32xf32, #tpu.memory_space<vmem>>, vector<1x1x32xf32>
    %110 = vector.shape_cast %109 : vector<1x1x32xf32> to vector<1x32xf32>
    %111 = vector.broadcast %110 : vector<1x32xf32> to vector<8x32xf32>
    %112 = arith.addf %108, %111 : vector<8x32xf32>
    %113 = arith.addf %112, %85 : vector<8x32xf32>
    %c0_59 = arith.constant 0 : index
    %c0_60 = arith.constant 0 : index
    %c0_61 = arith.constant 0 : index
    %114 = vector.load %arg16[%c0_59, %c0_60, %c0_61] : memref<1x1x32xf32, #tpu.memory_space<vmem>>, vector<1x1x32xf32>
    %115 = vector.shape_cast %114 : vector<1x1x32xf32> to vector<1x32xf32>
    %c0_62 = arith.constant 0 : index
    %c0_63 = arith.constant 0 : index
    %c0_64 = arith.constant 0 : index
    %116 = vector.load %arg17[%c0_62, %c0_63, %c0_64] : memref<1x1x32xf32, #tpu.memory_space<vmem>>, vector<1x1x32xf32>
    %117 = vector.shape_cast %116 : vector<1x1x32xf32> to vector<1x32xf32>
    %cst_65 = arith.constant dense<0.000000e+00> : vector<8xf32>
    %118 = vector.multi_reduction <add>, %113, %cst_65 [1] : vector<8x32xf32> to vector<8xf32>
    %119 = vector.shape_cast %118 : vector<8xf32> to vector<8x1xf32>
    %cst_66 = arith.constant 3.200000e+01 : f32
    %120 = vector.broadcast %cst_66 : f32 to vector<8x1xf32>
    %121 = arith.divf %119, %120 : vector<8x1xf32>
    %122 = vector.broadcast %121 : vector<8x1xf32> to vector<8x32xf32>
    %123 = arith.subf %113, %122 : vector<8x32xf32>
    %124 = arith.mulf %123, %123 : vector<8x32xf32>
    %cst_67 = arith.constant dense<0.000000e+00> : vector<8xf32>
    %125 = vector.multi_reduction <add>, %124, %cst_67 [1] : vector<8x32xf32> to vector<8xf32>
    %126 = vector.shape_cast %125 : vector<8xf32> to vector<8x1xf32>
    %cst_68 = arith.constant 3.200000e+01 : f32
    %127 = vector.broadcast %cst_68 : f32 to vector<8x1xf32>
    %128 = arith.divf %126, %127 : vector<8x1xf32>
    %129 = vector.broadcast %121 : vector<8x1xf32> to vector<8x32xf32>
    %130 = arith.subf %113, %129 : vector<8x32xf32>
    %cst_69 = arith.constant 9.99999996E-13 : f32
    %131 = vector.broadcast %cst_69 : f32 to vector<8x1xf32>
    %132 = arith.addf %128, %131 : vector<8x1xf32>
    %133 = math.rsqrt %132 : vector<8x1xf32>
    %134 = vector.broadcast %133 : vector<8x1xf32> to vector<8x32xf32>
    %135 = arith.mulf %130, %134 : vector<8x32xf32>
    %136 = vector.broadcast %115 : vector<1x32xf32> to vector<8x32xf32>
    %137 = arith.mulf %135, %136 : vector<8x32xf32>
    %138 = vector.broadcast %117 : vector<1x32xf32> to vector<8x32xf32>
    %139 = arith.addf %137, %138 : vector<8x32xf32>
    %c0_70 = arith.constant 0 : index
    %c0_71 = arith.constant 0 : index
    %c0_72 = arith.constant 0 : index
    %140 = vector.load %arg22[%c0_70, %c0_71, %c0_72] : memref<1x8x32xf32, #tpu.memory_space<vmem>>, vector<1x8x32xf32>
    %141 = vector.shape_cast %140 : vector<1x8x32xf32> to vector<8x32xf32>
    %142 = vector.shape_cast %139 : vector<8x32xf32> to vector<1x8x32xf32>
    tpu.vector_store %arg22[%c0_70, %c0_71, %c0_72], %142 {strides = array<i32>} : memref<1x8x32xf32, #tpu.memory_space<vmem>>, vector<1x8x32xf32>,
    %c1_i32 = arith.constant 1 : i32
    %143 = arith.cmpi eq, %arg1, %c1_i32 : i32
    %144 = arith.extui %143 : i1 to i32
    %c0_i32_73 = arith.constant 0 : i32
    %145 = arith.cmpi ne, %144, %c0_i32_73 : i32
    scf.if %145 {
      %146 = vector.extract_strided_slice %139 {offsets = [0, 0], sizes = [1, 32], strides = [1, 1]} : vector<8x32xf32> to vector<1x32xf32>
      %c0_74 = arith.constant 0 : index
      %c0_75 = arith.constant 0 : index
      %147 = vector.load %arg18[%c0_74, %c0_75] : memref<32x32xf32, #tpu.memory_space<vmem>>, vector<32x32xf32>
      %cst_76 = arith.constant dense<0.000000e+00> : vector<1x32xf32>
      %148 = tpu.matmul %146, %147, %cst_76 {dimension_numbers = #tpu.dot_dimension_numbers<[1], [0], [0], [1], [0, 0, 1, 1], [], []>} : vector<1x32xf32>, vector<32x32xf32>, vector<1x32xf32> -> vector<1x32xf32>
      %c0_77 = arith.constant 0 : index
      %c0_78 = arith.constant 0 : index
      %149 = vector.load %arg19[%c0_77, %c0_78] : memref<1x32xf32, #tpu.memory_space<vmem>>, vector<1x32xf32>
      %150 = arith.addf %148, %149 : vector<1x32xf32>
      %151 = math.tanh %150 : vector<1x32xf32>
      %c0_79 = arith.constant 0 : index
      %c0_80 = arith.constant 0 : index
      %c0_81 = arith.constant 0 : index
      %152 = vector.load %arg23[%c0_79, %c0_80, %c0_81] : memref<1x1x32xf32, #tpu.memory_space<vmem>>, vector<1x1x32xf32>
      %153 = vector.shape_cast %152 : vector<1x1x32xf32> to vector<1x32xf32>
      %154 = vector.shape_cast %151 : vector<1x32xf32> to vector<1x1x32xf32>
      tpu.vector_store %arg23[%c0_79, %c0_80, %c0_81], %154 {strides = array<i32>} : memref<1x1x32xf32, #tpu.memory_space<vmem>>, vector<1x1x32xf32>,
      %c0_82 = arith.constant 0 : index
      %c0_83 = arith.constant 0 : index
      %155 = vector.load %arg20[%c0_82, %c0_83] : memref<32x2xf32, #tpu.memory_space<vmem>>, vector<32x2xf32>
      %cst_84 = arith.constant dense<0.000000e+00> : vector<1x2xf32>
      %156 = tpu.matmul %151, %155, %cst_84 {dimension_numbers = #tpu.dot_dimension_numbers<[1], [0], [0], [1], [0, 0, 1, 1], [], []>} : vector<1x32xf32>, vector<32x2xf32>, vector<1x2xf32> -> vector<1x2xf32>
      %c0_85 = arith.constant 0 : index
      %c0_86 = arith.constant 0 : index
      %157 = vector.load %arg21[%c0_85, %c0_86] : memref<1x2xf32, #tpu.memory_space<vmem>>, vector<1x2xf32>
      %158 = arith.addf %156, %157 : vector<1x2xf32>
      %c0_87 = arith.constant 0 : index
      %c0_88 = arith.constant 0 : index
      %c0_89 = arith.constant 0 : index
      %159 = vector.load %arg24[%c0_87, %c0_88, %c0_89] : memref<1x1x2xf32, #tpu.memory_space<vmem>>, vector<1x1x2xf32>
      %160 = vector.shape_cast %159 : vector<1x1x2xf32> to vector<1x2xf32>
      %161 = vector.shape_cast %158 : vector<1x2xf32> to vector<1x1x2xf32>
      tpu.vector_store %arg24[%c0_87, %c0_88, %c0_89], %161 {strides = array<i32>} : memref<1x1x2xf32, #tpu.memory_space<vmem>>, vector<1x1x2xf32>,
    } else {
    }
    return
  }
  func.func @transform_0(%arg0: i32, %arg1: i32) -> (i32, i32, i32) {
    %c0_i32 = arith.constant 0 : i32
    %c0_i32_0 = arith.constant 0 : i32
    %c0_i32_1 = arith.constant 0 : i32
    return %arg0, %c0_i32, %c0_i32_0 : i32, i32, i32
  }
  func.func @transform_1(%arg0: i32, %arg1: i32) -> (i32, i32, i32, i32) {
    %c0_i32 = arith.constant 0 : i32
    %c0_i32_0 = arith.constant 0 : i32
    %c0_i32_1 = arith.constant 0 : i32
    %c0_i32_2 = arith.constant 0 : i32
    return %arg0, %c0_i32, %c0_i32_0, %c0_i32_1 : i32, i32, i32, i32
  }
  func.func @transform_2(%arg0: i32, %arg1: i32) -> (i32, i32) {
    %c0_i32 = arith.constant 0 : i32
    %c0_i32_0 = arith.constant 0 : i32
    %c0_i32_1 = arith.constant 0 : i32
    return %c0_i32, %c0_i32_0 : i32, i32
  }
  func.func @transform_3(%arg0: i32, %arg1: i32) -> (i32, i32) {
    %c0_i32 = arith.constant 0 : i32
    %c0_i32_0 = arith.constant 0 : i32
    %c0_i32_1 = arith.constant 0 : i32
    return %c0_i32, %c0_i32_0 : i32, i32
  }
  func.func @transform_4(%arg0: i32, %arg1: i32) -> (i32, i32, i32) {
    %c0_i32 = arith.constant 0 : i32
    %c0_i32_0 = arith.constant 0 : i32
    %c0_i32_1 = arith.constant 0 : i32
    return %arg1, %c0_i32, %c0_i32_0 : i32, i32, i32
  }
  func.func @transform_5(%arg0: i32, %arg1: i32) -> (i32, i32, i32) {
    %c0_i32 = arith.constant 0 : i32
    %c0_i32_0 = arith.constant 0 : i32
    %c0_i32_1 = arith.constant 0 : i32
    return %arg1, %c0_i32, %c0_i32_0 : i32, i32, i32
  }
  func.func @transform_6(%arg0: i32, %arg1: i32) -> (i32, i32, i32, i32) {
    %c0_i32 = arith.constant 0 : i32
    %c0_i32_0 = arith.constant 0 : i32
    %c0_i32_1 = arith.constant 0 : i32
    %c0_i32_2 = arith.constant 0 : i32
    return %arg1, %c0_i32, %c0_i32_0, %c0_i32_1 : i32, i32, i32, i32
  }
  func.func @transform_7(%arg0: i32, %arg1: i32) -> (i32, i32, i32) {
    %c0_i32 = arith.constant 0 : i32
    %c0_i32_0 = arith.constant 0 : i32
    %c0_i32_1 = arith.constant 0 : i32
    return %arg1, %c0_i32, %c0_i32_0 : i32, i32, i32
  }
  func.func @transform_8(%arg0: i32, %arg1: i32) -> (i32, i32, i32) {
    %c0_i32 = arith.constant 0 : i32
    %c0_i32_0 = arith.constant 0 : i32
    %c0_i32_1 = arith.constant 0 : i32
    return %arg1, %c0_i32, %c0_i32_0 : i32, i32, i32
  }
  func.func @transform_9(%arg0: i32, %arg1: i32) -> (i32, i32, i32) {
    %c0_i32 = arith.constant 0 : i32
    %c0_i32_0 = arith.constant 0 : i32
    %c0_i32_1 = arith.constant 0 : i32
    return %arg1, %c0_i32, %c0_i32_0 : i32, i32, i32
  }
  func.func @transform_10(%arg0: i32, %arg1: i32) -> (i32, i32, i32) {
    %c0_i32 = arith.constant 0 : i32
    %c0_i32_0 = arith.constant 0 : i32
    %c0_i32_1 = arith.constant 0 : i32
    return %arg1, %c0_i32, %c0_i32_0 : i32, i32, i32
  }
  func.func @transform_11(%arg0: i32, %arg1: i32) -> (i32, i32, i32) {
    %c0_i32 = arith.constant 0 : i32
    %c0_i32_0 = arith.constant 0 : i32
    %c0_i32_1 = arith.constant 0 : i32
    return %arg1, %c0_i32, %c0_i32_0 : i32, i32, i32
  }
  func.func @transform_12(%arg0: i32, %arg1: i32) -> (i32, i32, i32) {
    %c0_i32 = arith.constant 0 : i32
    %c0_i32_0 = arith.constant 0 : i32
    %c0_i32_1 = arith.constant 0 : i32
    return %arg1, %c0_i32, %c0_i32_0 : i32, i32, i32
  }
  func.func @transform_13(%arg0: i32, %arg1: i32) -> (i32, i32, i32) {
    %c0_i32 = arith.constant 0 : i32
    %c0_i32_0 = arith.constant 0 : i32
    %c0_i32_1 = arith.constant 0 : i32
    return %arg1, %c0_i32, %c0_i32_0 : i32, i32, i32
  }
  func.func @transform_14(%arg0: i32, %arg1: i32) -> (i32, i32, i32) {
    %c0_i32 = arith.constant 0 : i32
    %c0_i32_0 = arith.constant 0 : i32
    %c0_i32_1 = arith.constant 0 : i32
    return %arg1, %c0_i32, %c0_i32_0 : i32, i32, i32
  }
  func.func @transform_15(%arg0: i32, %arg1: i32) -> (i32, i32, i32) {
    %c0_i32 = arith.constant 0 : i32
    %c0_i32_0 = arith.constant 0 : i32
    %c0_i32_1 = arith.constant 0 : i32
    return %arg1, %c0_i32, %c0_i32_0 : i32, i32, i32
  }
  func.func @transform_16(%arg0: i32, %arg1: i32) -> (i32, i32) {
    %c0_i32 = arith.constant 0 : i32
    %c0_i32_0 = arith.constant 0 : i32
    %c0_i32_1 = arith.constant 0 : i32
    return %c0_i32, %c0_i32_0 : i32, i32
  }
  func.func @transform_17(%arg0: i32, %arg1: i32) -> (i32, i32) {
    %c0_i32 = arith.constant 0 : i32
    %c0_i32_0 = arith.constant 0 : i32
    %c0_i32_1 = arith.constant 0 : i32
    return %c0_i32, %c0_i32_0 : i32, i32
  }
  func.func @transform_18(%arg0: i32, %arg1: i32) -> (i32, i32) {
    %c0_i32 = arith.constant 0 : i32
    %c0_i32_0 = arith.constant 0 : i32
    %c0_i32_1 = arith.constant 0 : i32
    return %c0_i32, %c0_i32_0 : i32, i32
  }
  func.func @transform_19(%arg0: i32, %arg1: i32) -> (i32, i32) {
    %c0_i32 = arith.constant 0 : i32
    %c0_i32_0 = arith.constant 0 : i32
    %c0_i32_1 = arith.constant 0 : i32
    return %c0_i32, %c0_i32_0 : i32, i32
  }
  func.func @transform_20(%arg0: i32, %arg1: i32) -> (i32, i32, i32) {
    %c0_i32 = arith.constant 0 : i32
    %c0_i32_0 = arith.constant 0 : i32
    %c0_i32_1 = arith.constant 0 : i32
    return %arg0, %c0_i32, %c0_i32_0 : i32, i32, i32
  }
  func.func @transform_21(%arg0: i32, %arg1: i32) -> (i32, i32, i32) {
    %c0_i32 = arith.constant 0 : i32
    %c0_i32_0 = arith.constant 0 : i32
    %c0_i32_1 = arith.constant 0 : i32
    return %arg0, %c0_i32, %c0_i32_0 : i32, i32, i32
  }
  func.func @transform_22(%arg0: i32, %arg1: i32) -> (i32, i32, i32) {
    %c0_i32 = arith.constant 0 : i32
    %c0_i32_0 = arith.constant 0 : i32
    %c0_i32_1 = arith.constant 0 : i32
    return %arg0, %c0_i32, %c0_i32_0 : i32, i32, i32
  }
}

</mosaic_0001>

<bundles_post_ra>
// kernel: tpu_custom_call.1
= control target key start
LH: loop header
LB: loop body
LE: loop exit
PB: predicated region body
PF: predicated region fallthrough
CT: control target
= control target key end

     0   :  { %s3768_s0 = inlined_call_operand.hbm [shape: f32[2,8,32], index: 0, kind: input, shape index: {}]   ;;  %s3769_s1 = inlined_call_operand.hbm [shape: f32[2,2,8,8], index: 1, kind: input, shape index: {}]   ;;  %s3770_s2 = inlined_call_operand.vmem [shape: f32[1,32], index: 2, kind: input, shape index: {}]   ;;  %s3771_s3 = inlined_call_operand.hbm [shape: f32[1,32], index: 3, kind: input, shape index: {}]   ;;  %s3772_s4 = inlined_call_operand.vmem [shape: f32[2,32,96], index: 4, kind: input, shape index: {}]   ;;  %s3773_s5 = inlined_call_operand.vmem [shape: f32[2,1,96], index: 5, kind: input, shape index: {}]   ;;  %s3774_s6 = inlined_call_operand.vmem [shape: f32[2,2,16,32], index: 6, kind: input, shape index: {}]   ;;  %s3775_s7 = inlined_call_operand.vmem [shape: f32[2,1,32], index: 7, kind: input, shape index: {}]   ;;  %s3776_s8 = inlined_call_operand.vmem [shape: f32[2,1,32], index: 8, kind: input, shape index: {}]   ;;  %s3777_s9 = inlined_call_operand.vmem [shape: f32[2,1,32], index: 9, kind: input, shape index: {}]   ;;  %s3778_s10 = inlined_call_operand.vmem [shape: f32[2,32,64], index: 10, kind: input, shape index: {}]   ;;  %s3779_s11 = inlined_call_operand.vmem [shape: f32[2,1,64], index: 11, kind: input, shape index: {}]   ;;  %s3780_s12 = inlined_call_operand.vmem [shape: f32[2,64,32], index: 12, kind: input, shape index: {}]   ;;  %s3781_s13 = inlined_call_operand.vmem [shape: f32[2,1,32], index: 13, kind: input, shape index: {}]   ;;  %s3782_s14 = inlined_call_operand.vmem [shape: f32[2,1,32], index: 14, kind: input, shape index: {}]   ;;  %s3783_s15 = inlined_call_operand.vmem [shape: f32[2,1,32], index: 15, kind: input, shape index: {}]   ;;  %s3784_s16 = inlined_call_operand.hbm [shape: f32[32,32], index: 16, kind: input, shape index: {}]   ;;  %s3785_s17 = inlined_call_operand.vmem [shape: f32[1,32], index: 17, kind: input, shape index: {}]   ;;  %s3786_s18 = inlined_call_operand.vmem [shape: f32[32,2], index: 18, kind: input, shape index: {}]   ;;  %s3787_s19 = inlined_call_operand.vmem [shape: f32[1,2], index: 19, kind: input, shape index: {}]   ;;  %s3788_s20 = inlined_call_operand.hbm [shape: f32[2,8,32], index: 20, kind: output, shape index: {0}]   ;;  %s3789_s21 = inlined_call_operand.hbm [shape: f32[2,1,32], index: 21, kind: output, shape index: {1}]   ;;  %s3790_s22 = inlined_call_operand.hbm [shape: f32[2,1,2], index: 22, kind: output, shape index: {2}]  }
   0x1   :  { %3823 = sst [smem:[#allocation34_spill]] %s3768_s0 }
   0x2   :  { %3824 = sst [smem:[#allocation35_spill]] %s3769_s1 }
   0x3   :  { %3825 = sst [smem:[#allocation36_spill]] %s3770_s2 }
   0x4   :  { %3826 = sst [smem:[#allocation37_spill]] %s3771_s3 }
   0x5   :  { %3827 = sst [smem:[#allocation38_spill]] %s3772_s4 }
   0x6   :  { %3828 = sst [smem:[#allocation39_spill]] %s3773_s5 }
   0x7   :  { %3829 = sst [smem:[#allocation40_spill]] %s3774_s6 }
   0x8   :  { %3830 = sst [smem:[#allocation41_spill]] %s3778_s10 }
   0x9   :  { %3831 = sst [smem:[#allocation42_spill]] %s3779_s11 }
   0xa   :  { %3832 = sst [smem:[#allocation43_spill]] %s3783_s15 }
   0xb   :  { %3833 = sst [smem:[#allocation44_spill]] %s3784_s16 }
   0xc   :  { %3834 = sst [smem:[#allocation45_spill]] %s3785_s17 }
   0xd   :  { %3835 = sst [smem:[#allocation46_spill]] %s3786_s18 }
   0xe   :  { %3836 = sst [smem:[#allocation47_spill]] %s3787_s19 }
   0xf   :  { %3837 = sst [smem:[#allocation48_spill]] %s3788_s20 }
  0x10   :  { %3838 = sst [smem:[#allocation49_spill]] %s3789_s21 }
  0x11   :  { %3839 = sst [smem:[#allocation50_spill]] %s3790_s22 }
  0x12   :  { %28 = vsyncpa [#allocation3], 0 }
  0x13   :  { %30 = vsyncpa [#allocation3 + $0x1], 0 }
  0x14   :  { %31 = vsyncpa [#allocation6], 0 }
  0x15   :  { %33 = vsyncpa [#allocation6 + $0x1], 0 }
  0x16   :  { %34 = vsyncpa [#allocation9], 0 }
  0x17   :  { %35 = vsyncpa [#allocation4], 0 }
  0x18   :  { %37 = vsyncpa [#allocation4 + $0x1], 0 }
  0x19   :  { %38 = vsyncpa [#allocation12], 0 }
  0x1a   :  { %40 = vsyncpa [#allocation12 + $0x1], 0  ;;  %s3168_s3 = smov 0   ;;  %s3170_s28 = smov 0  }
  0x1b   :  { %s3172_s29 = smov 0   ;;  %s3174_s30 = smov 0  }
  0x1c   :  { %s3176_s4 = smov 0   ;;  %s3178_s0 = smov 0  }
  0x1d   :  { %s3180_s23 = smov 0   ;;  %s3182_s1 = smov 0  }
  0x1e LB: > { %3840 = sst [smem:[#allocation20_spill]] %s3005_s3  ;;  %s3209_s5 = sadd.s32 4294967295, %s3033_s1   ;;  %s3033_s1 = sphi %s3182_s1, %s46_s1   ;;  %s3029_s23 = sphi %s3180_s23, %s3914_s23   ;;  %s3025_s0 = sphi %s3178_s0, %s3913_s0   ;;  %s3021_s4 = sphi %s3176_s4, %s3912_s4   ;;  %s3017_s30 = sphi %s3174_s30, %s3911_s30   ;;  %s3013_s29 = sphi %s3172_s29, %s3910_s29   ;;  %s3009_s28 = sphi %s3170_s28, %s3909_s28   ;;  %s3005_s3 = sphi %s3168_s3, %s3908_s3  }
  0x1f   : > { %3841 = sst [smem:[#allocation21_spill]] %s3009_s28  ;;  %s3794_s24 = sadd.s32 4294967294, %s3033_s1  }
  0x20   : > { %3842 = sst [smem:[#allocation22_spill]] %s3013_s29  ;;  %p78_p0 = scmp.ne.s32.totalorder %s3009_s28, %s3005_s3 }
  0x21   : > { %3843 = sst [smem:[#allocation23_spill]] %s3021_s4  ;;  %p3802_p1 = scmp.eq.s32.totalorder %s3209_s5, 0 }
  0x22   : > { %3844 = sst [smem:[#allocation24_spill]] %s3025_s0  ;;  %p572_p3 = scmp.eq.s32.totalorder %s3794_s24, 3 }
  0x23   : > { %3845 = sst [smem:[#allocation25_spill]] %s3029_s23  ;;  %p3220_p4 = por %p3802_p1, %p78_p0 }
  0x24   : > { %3846 = sst [smem:[#allocation26_spill]] %s3033_s1  ;;  %p2361_p5 = scmp.ge.s32.totalorder %s3033_s1, 1 }
  0x25   : > { %3847 = sst [smem:[#allocation27_spill]] %s3209_s5  ;;  %p3225_p6 = por %p572_p3, %p78_p0 }
  0x26   : > { %s3848_s6 = scalar_select %p3220_p4, 1, 0 }
  0x27   : > { %s3849_s25 = scalar_select %p3225_p6, 1, 0 }
  0x28   : > { %p631_p7 = scmp.lt.s32.totalorder %s3033_s1, 5  ;;  %s3035_s2 = smov [#allocation7]  }
  0x29   : > { %3850 = sst [smem:[#allocation28_spill]] %s3849_s25  ;;  %s647_s27 = sshll.u32 %s3035_s2, 4  ;;  %s648_s27 = int_to_ptr.vmem [resolvable:$true] %s647_s27 }
  0x2a   : > { %p3230_p8 = pnand %p2361_p5, %p631_p7  ;;  %s3036_s24 = smov [#allocation8]  }
  0x2b   : > { %s657_s3 = sshll.u32 %s3036_s24, 4  ;;  %s3853_s21 = sld [smem:[#allocation37_spill]]  ;;  %s3242_s3 = int_to_ptr.vmem [resolvable:$true] %s657_s3 }
  0x2c   : > { %s3851_s26 = scalar_select %p3230_p8, 1, 0 }
  0x2d   : > { %p2622_p9 = pneg %p3230_p8 }
  0x2f   : > { %p3238_p10 = pnand %p2622_p9, %p3802_p1 }
  0x31   : > { %s2747_s4 = scalar_lea.hbm %s3853_s21, 16  ;;  %p2749_p12 = pneg %p3238_p10 }
  0x32   : > { %p2748_p11 = scmp.ne.s32.totalorder %s3853_s21, %s2747_s4  ;;  %p2754_p3 = scmp.lt.u32.totalorder %s2747_s4, %s3853_s21 }
  0x34   : > { %p2750_p13 = pnand %p2749_p12, %p2748_p11 }
  0x36   : > { %p2751_p0 = pneg %p2750_p13 }
  0x38   : > { %p2756_p5 = pnand %p2754_p3, %p2751_p0 }
  0x3a   : > { %2759 = shalt.err (!%p2756_p5)
}
  0x3b   : > { %s2760_s18 = scalar_lea.vmem %s648_s27, 16  ;;  %s2767_s19 = scalar_lea.vmem %s648_s27, 32 }
  0x3c   : > { %p2761_p7 = scmp.ne.s32.totalorder %s648_s27, %s2760_s18  ;;  %p2768_p2 = scmp.lt.s32.totalorder %s648_s27, %s648_s27 }
  0x3d   : > { %p2769_p6 = scmp.lt.s32.totalorder %s2767_s19, %s2760_s18 }
  0x3e   : > { %p2763_p9 = pnand %p2761_p7, %p2749_p12 }
  0x3f   : > { %p2770_p4 = por %p2769_p6, %p2768_p2 }
  0x40   : > { %p2764_p1 = pneg %p2763_p9 }
  0x42   : > { %p2771_p8 = pnand %p2770_p4, %p2764_p1 }
  0x44   : > { %2774 = shalt.err (!%p2771_p8)
}
  0x45   : > { %2625 = dma.hbm_to_vmem [thread:$0]  (!%p3238_p10), %s3853_s21, 16, %s648_s27, [#allocation6]  }
  0x46   : > { %s3854_s16 = sld [smem:[#allocation44_spill]] }
  0x4c   : > { %s2775_s2 = scalar_lea.hbm %s3854_s16, 512 }
  0x4d   : > { %p2776_p11 = scmp.ne.s32.totalorder %s3854_s16, %s2775_s2  ;;  %p2782_p4 = scmp.lt.u32.totalorder %s2775_s2, %s3854_s16 }
  0x4f   : > { %p2778_p2 = pnand %p2776_p11, %p2749_p12 }
  0x51   : > { %p2779_p1 = pneg %p2778_p2 }
  0x53   : > { %p2784_p6 = pnand %p2782_p4, %p2779_p1 }
  0x55   : > { %2787 = shalt.err (!%p2784_p6)
}
  0x56   : > { %s2788_s27 = scalar_lea.vmem %s3242_s3, 512  ;;  %p2796_p3 = scmp.lt.s32.totalorder %s3242_s3, %s3242_s3 }
  0x57   : > { %p2789_p8 = scmp.ne.s32.totalorder %s3242_s3, %s2788_s27  ;;  %p2797_p5 = scmp.lt.s32.totalorder %s2788_s27, %s2788_s27 }
  0x59   : > { %p2791_p13 = pnand %p2789_p8, %p2749_p12  ;;  %p2798_p7 = por %p2797_p5, %p2796_p3 }
  0x5b   : > { %p2792_p0 = pneg %p2791_p13 }
  0x5d   : > { %p2799_p9 = pnand %p2798_p7, %p2792_p0 }
  0x5f   : > { %2802 = shalt.err (!%p2799_p9)
}
  0x60   : > { %s3805_s15 = smov 128   ;;  %s3806_s20 = smov 8  }
  0x61   : > { %2628 = dma.hbm_to_vmem [thread:$0]  (!%p3238_p10), %s3854_s16, 512, %s3242_s3, [#allocation9], %s3805_s15, %s3805_s15, %s3806_s20  }
  0x62   : > { %s55_s25 = sadd.s32 1, %s3025_s0  ;;  %s58_s2 = sadd.s32 1, %s3029_s23 }
  0x63   : > { %p56_p12 = scmp.ge.s32.totalorder %s55_s25, 2  ;;  %s65_s24 = sadd.s32 1, %s3013_s29 }
  0x64   : > { %p72_p11 = scmp.ne.s32.totalorder %s3013_s29, %s3009_s28  ;;  %p73_p2 = scmp.eq.s32.totalorder %s3033_s1, 0 }
  0x65   : > { %s3916_s25 = smov (%p56_p12, %s55_s25), 0  ;;  %s3918_s2 = smov (!%p56_p12, %s58_s2), %s3029_s23 }
  0x66   : > { %3855 = sst [smem:[#allocation29_spill]] %s3916_s25  ;;  %p3303_p1 = por %p73_p2, %p72_p11 }
  0x67   : > { %p3857_p4 = scmp.eq.s32.totalorder %s3209_s5, 3  ;;  %p60_p10 = scmp.ge.s32.totalorder %s3918_s2, 2 }
  0x68   : > { %p2648_p8 = scmp.lt.s32.totalorder %s3033_s1, 4  ;;  %s3315_s3 = sand.u32 1, %s3013_s29  }
  0x69   : > { %p3309_p6 = por %p3857_p4, %p72_p11  ;;  %s2366_s19 = sshll.u32 %s3029_s23, 7 }
  0x6a   : > { %s3920_s2 = smov (%p60_p10, %s3918_s2), 0  ;;  %s2365_s27 = sshll.u32 %s3315_s3, 3 }
  0x6b   : > { %s3858_s18 = scalar_select %p3309_p6, 1, 0 }
  0x6c   : > { %3860 = sst [smem:[#allocation31_spill]] %s3920_s2  ;;  %s62_s17 = ssub.s32 %s3029_s23, %s3920_s2 }
  0x6d   : > { %3859 = sst [smem:[#allocation30_spill]] %s3858_s18  ;;  %p63_p13 = scmp.eq.s32.totalorder %s62_s17, 0 }
  0x6e   : > { %s3861_s20 = sld [smem:[#allocation34_spill]]  ;;  %s684_s21 = scalar_lea.vmem [#allocation2], %s2365_s27 }
  0x6f   : > { %s691_s25 = sshll.u32 %s684_s21, 4  ;;  %p3330_p0 = pnand %p2648_p8, %p3303_p1  ;;  %s3337_s25 = int_to_ptr.vmem [resolvable:$true] %s691_s25 }
  0x70   : > { %s3335_s2 = scalar_select %p63_p13, %s3013_s29, %s65_s24  }
  0x71   : > { %s681_s15 = scalar_lea.sflag [#allocation3], %s3315_s3  ;;  %p2805_p5 = pneg %p3330_p0 }
  0x72   : > { %3863 = sst [smem:[#allocation32_spill]] %s3335_s2 }
  0x74   : > { %s3326_s16 = scalar_lea.hbm %s3861_s20, %s2366_s19  ;;  %s2808_s27 = scalar_lea.hbm %s3861_s20, 256 }
  0x75   : > { %s2803_s19 = scalar_lea.hbm %s3326_s16, 128  ;;  %p2809_p12 = scmp.lt.u32.totalorder %s3326_s16, %s3861_s20 }
  0x76   : > { %p2804_p3 = scmp.ne.s32.totalorder %s3326_s16, %s2803_s19  ;;  %p2810_p11 = scmp.lt.u32.totalorder %s2808_s27, %s2803_s19 }
  0x77   : > { %p2812_p1 = scmp.lt.u32.totalorder %s2803_s19, %s3326_s16 }
  0x78   : > { %p2806_p7 = pnand %p2805_p5, %p2804_p3  ;;  %p2811_p2 = por %p2810_p11, %p2809_p12 }
  0x7a   : > { %p2807_p9 = pneg %p2806_p7  ;;  %p2813_p4 = por %p2812_p1, %p2811_p2 }
  0x7c   : > { %p2814_p10 = pnand %p2813_p4, %p2807_p9 }
  0x7e   : > { %2817 = shalt.err (!%p2814_p10)
}
  0x7f   : > { %s2818_s24 = scalar_lea.vmem %s3337_s25, 128  ;;  %s3039_s21 = smov [#allocation2]  }
  0x80   : > { %p2819_p8 = scmp.ne.s32.totalorder %s3337_s25, %s2818_s24  ;;  %s2823_s22 = sshll.u32 %s3039_s21, 4  ;;  %s2824_s22 = int_to_ptr.vmem [resolvable:$false] %s2823_s22 }
  0x81   : > { %s2825_s17 = scalar_lea.vmem %s2824_s22, 256  ;;  %p2826_p7 = scmp.lt.s32.totalorder %s3337_s25, %s2824_s22 }
  0x82   : > { %p2821_p13 = pnand %p2819_p8, %p2805_p5  ;;  %p2827_p12 = scmp.lt.s32.totalorder %s2825_s17, %s2818_s24 }
  0x84   : > { %p2822_p3 = pneg %p2821_p13  ;;  %p2828_p11 = por %p2827_p12, %p2826_p7 }
  0x86   : > { %p2829_p2 = pnand %p2828_p11, %p2822_p3 }
  0x88   : > { %2832 = shalt.err (!%p2829_p2)
}
  0x89   : > { %2632 = dma.hbm_to_vmem [thread:$0]  (!%p3330_p0), %s3326_s16, 128, %s3337_s25, %s681_s15  }
  0x8a   : > { %s2367_s19 = sshll.u32 %s3315_s3, 4  ;;  %s698_s27 = sand.u32 1, %s3033_s1  }
  0x8b   : > { %s702_s4 = scalar_lea.vmem [#allocation5], %s2367_s19  ;;  %s2417_s20 = sshll.u32 %s3029_s23, 8 }
  0x8c   : > { %s709_s21 = sshll.u32 %s702_s4, 4  ;;  %s3864_s17 = sld [smem:[#allocation35_spill]]  ;;  %s3368_s21 = int_to_ptr.vmem [resolvable:$true] %s709_s21 }
  0x8d   : > { %s3375_s29 = scalar_lea.sflag [#allocation6], %s698_s27 }
  0x92   : > { %s3373_s2 = scalar_lea.hbm %s3864_s17, %s2417_s20  ;;  %s2838_s3 = scalar_lea.hbm %s3864_s17, 512 }
  0x93   : > { %s2833_s18 = scalar_lea.hbm %s3373_s2, 256  ;;  %p2839_p10 = scmp.lt.u32.totalorder %s3373_s2, %s3864_s17 }
  0x94   : > { %p2834_p9 = scmp.ne.s32.totalorder %s3373_s2, %s2833_s18  ;;  %p2840_p8 = scmp.lt.u32.totalorder %s2838_s3, %s2833_s18 }
  0x95   : > { %p2842_p3 = scmp.lt.u32.totalorder %s2833_s18, %s3373_s2 }
  0x96   : > { %p2836_p1 = pnand %p2834_p9, %p2805_p5  ;;  %p2841_p13 = por %p2840_p8, %p2839_p10 }
  0x98   : > { %p2837_p4 = pneg %p2836_p1  ;;  %p2843_p7 = por %p2842_p3, %p2841_p13 }
  0x9a   : > { %p2844_p12 = pnand %p2843_p7, %p2837_p4 }
  0x9c   : > { %2847 = shalt.err (!%p2844_p12)
}
  0x9d   : > { %s2848_s20 = scalar_lea.vmem %s3368_s21, 256  ;;  %s3040_s27 = smov [#allocation5]  }
  0x9e   : > { %p2849_p11 = scmp.ne.s32.totalorder %s3368_s21, %s2848_s20  ;;  %s2853_s4 = sshll.u32 %s3040_s27, 4  ;;  %s2854_s4 = int_to_ptr.vmem [resolvable:$false] %s2853_s4 }
  0x9f   : > { %s2855_s24 = scalar_lea.vmem %s2854_s4, 512  ;;  %p2856_p1 = scmp.lt.s32.totalorder %s3368_s21, %s2854_s4 }
  0xa0   : > { %p2851_p2 = pnand %p2849_p11, %p2805_p5  ;;  %p2857_p10 = scmp.lt.s32.totalorder %s2855_s24, %s2848_s20 }
  0xa2   : > { %p2852_p9 = pneg %p2851_p2  ;;  %p2858_p8 = por %p2857_p10, %p2856_p1 }
  0xa4   : > { %p2859_p13 = pnand %p2858_p8, %p2852_p9 }
  0xa6   : > { %2862 = shalt.err (!%p2859_p13)
}
  0xa7   : > { %s3865_s18 = smov 8   ;;  %s3866_s22 = smov 128  }
  0xa8   : > { %2635 = dma.hbm_to_vmem [thread:$0]  (!%p3330_p0), %s3373_s2, 256, %s3368_s21, %s3375_s29, %s3866_s22, %s3866_s22, %s3865_s18  }
  0xa9   : > { %p3867_p5 = scmp.ne.s32.totalorder %s3851_s26, 0 }
  0xab   : > { %801 = sbr.rel (%p3867_p5) target bundleno = 3527 (0xdc7), region = 100 }
  0xb2   : > { %s3407_s16 = sand.u32 1, %s3009_s28   ;;  %p3868_p4 = scmp.ne.s32.totalorder %s3848_s6, 0 }
  0xb3   : > { %s3815_s25 = sshll.u32 %s3407_s16, 3  ;;  %s804_s3 = scalar_lea.sflag [#allocation3], %s3407_s16 }
  0xb4   : > { %s3413_s0 = scalar_lea.vmem [#allocation2], %s3815_s25 }
  0xb5   : > { %2980 = dma.done.wait (%p3868_p4), %s804_s3, 128  }
  0xb6   : > { %2982 = vsyncadd (%p3868_p4), %s804_s3, 4294967168  ;;  %s3814_s29 = sand.u32 1, %s3209_s5   ;;  %s2372_s26 = sshll.u32 %s3407_s16, 4 }
  0xb7   : > { %s813_s2 = scalar_lea.sflag [#allocation6], %s3814_s29  ;;  %s3423_s21 = scalar_lea.vmem [#allocation5], %s2372_s26 }
  0xb8   : > { %2984 = dma.done.wait (%p3868_p4), %s813_s2, 256  }
  0xb9   : > { %2986 = vsyncadd (%p3868_p4), %s813_s2, 4294967040  ;;  %p3869_p0 = scmp.eq.s32.totalorder %s3209_s5, 0 }
  0xbb   : > { %2988 = dma.done.wait (%p3869_p0), [#allocation6], 16   ;;  %p3870_p3 = pmov %p3869_p0 }
  0xbc   : > { %p3871_p7 = pmov %p3869_p0 }
  0xbd   : > { %2990 = vsyncadd (%p3870_p3), [#allocation6], 4294967280 }
  0xbe   : > { %2992 = dma.done.wait (%p3871_p7), [#allocation9], 512   ;;  %p3872_p12 = pmov %p3869_p0 }
  0xbf   : > { %p942_p11 = scmp.lt.s32.totalorder %s3017_s30, 1  ;;  %s3874_s22 = sld [smem:[#allocation38_spill]] }
  0xc0   : > { %2994 = vsyncadd (%p3872_p12), [#allocation9], 4294966784  ;;  %s3875_s29 = sld [smem:[#allocation40_spill]]  ;;  %s3877_s10 = sld [smem:[#allocation41_spill]] }
  0xc1   : > { %s3439_s15 = scalar_select %p942_p11, %s3017_s30, 1 }
  0xc2   : > { %s3879_s19 = sld [smem:[#allocation43_spill]]  ;;  %s3880_s26 = sshll.u32 %s3407_s16, 3 }
  0xc3   : > { %s2418_s6 = sshll.u32 %s3439_s15, 5  ;;  %s979_s20 = scalar_lea.vmem %s3781_s13, %s3439_s15 }
  0xc4   : > { %s982_s24 = scalar_lea.vmem %s3782_s14, %s3439_s15  ;;  %s935_s2 = scalar_lea.vmem [#allocation11], %s3407_s16 }
  0xc5   : > { %s3449_s3 = scalar_lea.vmem %s3874_s22, %s2418_s6  ;;  %s941_s11 = scalar_lea.vmem [#allocation13], %s3407_s16 }
  0xc6   : > { %s3454_s25 = scalar_lea.vmem %s3875_s29, %s2418_s6  ;;  %s3471_s22 = scalar_lea.vmem %s3877_s10, %s2418_s6 }
  0xc7   : > { %3876 = sst [smem:[#allocation33_spill]] %s3454_s25  ;;  %s2421_s25 = sshll.u32 %s3439_s15, 6 }
  0xc8   : > { %s3481_s28 = scalar_lea.vmem %s3780_s12, %s2421_s25  ;;  %s985_s10 = scalar_lea.vmem %s3879_s19, %s3439_s15 }
  0xc9   : > { %s3497_s29 = scalar_lea.vmem [#allocation10], %s3880_s26  ;;  %p2384_p2 = scmp.ne.s32.totalorder %s3017_s30, 0 }
  0xca   : > { %v990_v0 = vld [vmem:[%s3413_s0] sm:$0xff] (!%p2384_p2)  ;;  %vm993_vm0 = vcmask (!%p2384_p2), 261120   ;;  %s3881_s0 = sld [smem:[#allocation36_spill]] (!%p2384_p2)  ;;  %v2386_v13 = vld [vmem:[#allocation7] ss:$0 sm:$0xff] (!%p2384_p2) }
  0xcb   : > { %989 = sbr.rel (%p2384_p2) target bundleno = 517 (0x205), region = 120  ;;  %v994_v1 = vsel (!%p2384_p2), %vm993_vm0, %v990_v0, 0.0 }
  0xcc   : > { %995 = vadd.xlane.f32.xlu0 (!%p2384_p2), %v994_v1 }
  0xd0   : > { %v2385_v11 = vld [vmem:[%s3881_s0] ss:$0 sm:$0xff] (!%p2384_p2) }
 0x159   : > { %v996_v2 = vpop.xlane.xlu0 %995 }
 0x15a   : > { %v998_v3 = vmul.f32 0.03125, %v996_v2 }
 0x15c   : > { %v999_v4 = vsub.f32 %v990_v0, %v998_v3 }
 0x15e   : > { %v1000_v5 = vmul.f32 %v999_v4, %v999_v4 }
 0x160   : > { %v1001_v6 = vsel %vm993_vm0, %v1000_v5, 0.0 }
 0x161   : > { %1002 = vadd.xlane.f32.xlu0 %v1001_v6 }
 0x1ee   : > { %v1003_v7 = vpop.xlane.xlu0 %1002 }
 0x1ef   : > { %v1004_v8 = vmul.f32 0.03125, %v1003_v7 }
 0x1f1   : > { %v1005_v9 = vadd.f32 1e-12, %v1004_v8 }
 0x1f3   : > { %2729 = vrsqrt.f32 %v1005_v9 }
 0x1fd   : > { %v2730_v10 = vpop.eup %2729 }
 0x1fe   : > { %v1007_v12 = vmul.f32 %v2730_v10, %v999_v4 }
 0x200   : > { %v1014_v14 = vmul.f32 %v2385_v11, %v1007_v12 }
 0x202   : > { %v1021_v15 = vadd.f32 %v2386_v13, %v1014_v14 }
 0x204   : > { %1022 = vst.msk [vmem:[%s3497_s29] sm:$0xff] %vm993_vm0, %v1021_v15 }
 0x205 PF: > { %v1024_v16 = vld [vmem:[%s3449_s3] sm:$0xff]  ;;  %v1025_v17 = vld [vmem:[%s3449_s3 + $0x8] sm:$0xff]  ;;  %v1026_v18 = vld [vmem:[%s3449_s3 + $0x10] sm:$0xff]  ;;  %v3041_v19 = vmov 0.0|0.0   ;;  %vm3042_vm1 = vmmov 0   ;;  %v3043_v22 = vmov 0.0   ;;  %s3885_s26 = scalar_lea.vmem %s3775_s7, %s3439_s15  ;;  %s3886_s0 = scalar_lea.vmem %s3776_s8, %s3439_s15 }
 0x206   : > { %2562 = vmatprep.subr.bf16.mxu0 %v3041_v19  ;;  %v2563_v20 = vpack.c.bf16 %v1025_v17, %v1024_v16  ;;  %v1027_v21 = vld [vmem:[%s3449_s3 + $0x18] sm:$0xff]  ;;  %2473 = vmatprep.mubr.msk.f32.mxu0 %vm3042_vm1, %v3043_v22  ;;  %vm1035_vm2 = vcmask 261120   ;;  %s3882_s23 = sld [smem:[#allocation39_spill]]  ;;  %s3044_s1 = smov 112   ;;  %vm1114_vm3 = vcmask 130048   ;;  %v1267_v33 = vld [vmem:[%s3423_s21] sm:$0xff] }
 0x207   : > { %2481 = vmatprep.subr.mxu1 %v3043_v22  ;;  %2483 = vmatprep.mubr.msk.f32.mxu1 %vm3042_vm1, %v3043_v22  ;;  %v2566_v23 = vpack.c.bf16 %v1027_v21, %v1026_v18  ;;  %s3045_s5 = smov 96   ;;  %vm1271_vm4 = vcmask 64512   ;;  %v1268_v39 = vld [vmem:[%s3423_s21 + $0x8] sm:$0xff]  ;;  %s3884_s27 = sld [smem:[#allocation33_spill]]  ;;  %v2396_v10 = vld [vmem:[%s3885_s26] ss:$0 sm:$0xff] }
 0x208   : > { %2564 = vmatpush3.bf16.msra.mxu0 %v2563_v20  ;;  %s3046_s6 = smov 64   ;;  %vm1745_vm5 = vcmask 523264   ;;  %p2408_p9 = scmp.ne.s32.totalorder %s3017_s30, 1 }
 0x209   : > { %2565 = vmatprep.subr.bf16.mxu0 %v3041_v19  ;;  %vm3048_vm6 = vmmov (!%p2408_p9), 0   ;;  %vm1933_vm7 = vcmask (!%p2408_p9), 253952   ;;  %vm2013_vm8 = vcmask (!%p2408_p9), 8192  }
 0x20b   : > { %v3522_v24 = vld [vmem:[%s3497_s29] sm:$0xff] }
 0x20c   : > { %2567 = vmatpush3.bf16.msra.mxu0 %v2566_v23  ;;  %s3883_s17 = scalar_lea.vmem %s3882_s23, %s3439_s15  ;;  %v1637_v23 = vld [vmem:[%s3471_s22] sm:$0xff] }
 0x20d   : > { %2476 = vmatprep.subr.mxu0 %v3043_v22  ;;  %v2387_v25 = vld [vmem:[%s3883_s17] ss:$0 sm:$0xff]  ;;  %v1448_v57 = vld [vmem:[%s3884_s27 + $0x8] sm:$0xff]  ;;  %v2397_v63 = vld [vmem:[%s3884_s27 + $0x10] sm:$0xff]  ;;  %s3892_s17 = sld [smem:[#allocation45_spill]] (!%p2408_p9) }
 0x20e   : > { %v1447_v56 = vld [vmem:[%s3884_s27] sm:$0xff]  ;;  %v2398_v0 = vld [vmem:[%s3884_s27 + $0x18] sm:$0xff] }
 0x20f   : > { %2474 = vmatmul.mubr.msk.f32.vlgmr.msra.gmra.mrb[0].mxu0 %vm1035_vm2, %v3522_v24  ;;  %v2569_v59 = vpack.c.bf16 %v1448_v57, %v1447_v56  ;;  %v2572_v2 = vpack.c.bf16 %v2398_v0, %v2397_v63 }
 0x210   : > { %2478 = vmatprep.mubr.msk.f32.mxu0 %vm3042_vm1, %v3043_v22 }
 0x2e2   : > { %v1105_v26 = vpop.f32.mrb[0].mxu0 }
 0x2e3   : > { %v1106_v27 = vadd.f32 %v2387_v25, %v1105_v26  ;;  %v2475_v28 = vpop.f32.mrb[1].mxu0  ;;  %v1638_v25 = vld [vmem:[%s3471_s22 + $0x8] sm:$0xff] }
 0x2e4   : > { %v2575_v26 = vpack.c.bf16 %v1638_v25, %v1637_v23  ;;  %v1857_v25 = vld [vmem:[#allocation8 + $0x18] sm:$0xff] (!%p2408_p9) }
 0x2e5   : > { %1110 = vrot.lane.b32.xlu0 %v1106_v27, %s3044_s1  ;;  %s3888_s1 = sld [smem:[#allocation42_spill]] }
 0x2e9   : > { %1112 = vrot.lane.b32.xlu0 %v1106_v27, %s3045_s5 }
 0x357   : > { %v1111_v29 = vpop.permute.xlu0 %1110 }
 0x358   : > { %1189 = vrot.lane.b32.xlu1 %v1111_v29, %s3045_s5  ;;  %s3889_s5 = scalar_lea.vmem %s3888_s1, %s3439_s15 }
 0x35b   : > { %v1113_v30 = vpop.permute.xlu0 %1112 }
 0x35c   : > { %2477 = vmatpush3.xpose.msk.msra.mxu0 %vm1114_vm3, %v1113_v30 }
 0x35d   : > { %2486 = vmatprep.subr.mxu0 %v3043_v22 }
 0x35f   : > { %2479 = vmatmul.mubr.msk.f32.vlgmr.msra.gmra.mrb[2].mxu0 %vm1114_vm3, %v1106_v27 }
 0x360   : > { %2488 = vmatprep.mubr.msk.f32.mxu0 %vm3042_vm1, %v3043_v22 }
 0x3ca   : > { %v1190_v31 = vpop.permute.xlu1 %1189 }
 0x3cb   : > { %2482 = vmatpush3.xpose.msk.msra.mxu1 %vm1114_vm3, %v1190_v31 }
 0x3cc   : > { %2491 = vmatprep.subr.mxu1 %v3043_v22 }
 0x3ce   : > { %2484 = vmatmul.mubr.msk.f32.vlgmr.msra.gmra.mrb[0].mxu1 %vm1114_vm3, %v1111_v29 }
 0x3cf   : > { %2493 = vmatprep.mubr.msk.f32.mxu1 %vm3042_vm1, %v3043_v22 }
 0x432   : > { %v1185_v32 = vpop.f32.mrb[2].mxu0 }
 0x433   : > { %v1265_v34 = vmul.f32 0.25, %v1185_v32  ;;  %v2480_v35 = vpop.f32.mrb[3].mxu0 }
 0x435   : > { %v1269_v36 = vadd.f32 %v1267_v33, %v1265_v34  ;;  %v2400_v33 = vld [vmem:[%s3886_s0] ss:$0 sm:$0xff] }
 0x437   : > { %v1272_v37 = vsel %vm1271_vm4, %v1269_v36, -inf }
 0x438   : > { %1273 = vmax.xlane.f32.xlu1 %v1272_v37 }
 0x4a1   : > { %v1261_v38 = vpop.f32.mrb[0].mxu1 }
 0x4a2   : > { %v1266_v40 = vmul.f32 0.25, %v1261_v38  ;;  %v2485_v41 = vpop.f32.mrb[1].mxu1  ;;  %v1730_v38 = vld [vmem:[%s3481_s28] sm:$0xff] }
 0x4a3   : > { %v1732_v41 = vld [vmem:[%s3481_s28 + $0x10] sm:$0xff] }
 0x4a4   : > { %v1270_v42 = vadd.f32 %v1268_v39, %v1266_v40  ;;  %v1731_v39 = vld [vmem:[%s3481_s28 + $0x8] sm:$0xff] }
 0x4a5   : > { %v2581_v40 = vpack.c.bf16 %v1731_v39, %v1730_v38 }
 0x4a6   : > { %v1275_v43 = vsel %vm1271_vm4, %v1270_v42, -inf }
 0x4a7   : > { %1276 = vmax.xlane.f32.xlu0 %v1275_v43 }
 0x4c5   : > { %v1274_v44 = vpop.xlane.xlu1 %1273 }
 0x4c6   : > { %v1278_v45 = vsub.f32 %v1269_v36, %v1274_v44  ;;  %v1734_v44 = vld [vmem:[%s3481_s28 + $0x20] sm:$0xff] }
 0x4c8   : > { %v1280_v46 = vmul.f32 1.442695, %v1278_v45  ;;  %v1735_v45 = vld [vmem:[%s3481_s28 + $0x28] sm:$0xff] }
 0x4ca   : > { %2731 = vpow2.f32 %v1280_v46  ;;  %v2587_v46 = vpack.c.bf16 %v1735_v45, %v1734_v44 }
 0x4d4   : > { %v2732_v47 = vpop.eup %2731 }
 0x4d5   : > { %v1284_v48 = vsel %vm1271_vm4, %v2732_v47, 0.0 }
 0x4d6   : > { %1285 = vadd.xlane.f32.xlu0 %v1284_v48  ;;  %v1737_v48 = vld [vmem:[%s3481_s28 + $0x38] sm:$0xff] }
 0x4ec   : > { %1294 = vrot.lane.b32.xlu0 %v1106_v27, %s3046_s6  ;;  %v1640_v27 = vld [vmem:[%s3471_s22 + $0x18] sm:$0xff] }
 0x534   : > { %v1277_v49 = vpop.xlane.xlu0 %1276 }
 0x535   : > { %v1279_v50 = vsub.f32 %v1270_v42, %v1277_v49  ;;  %v1733_v42 = vld [vmem:[%s3481_s28 + $0x18] sm:$0xff] }
 0x536   : > { %v2584_v43 = vpack.c.bf16 %v1733_v42, %v1732_v41 }
 0x537   : > { %v1282_v51 = vmul.f32 1.442695, %v1279_v50  ;;  %v2402_v50 = vld [vmem:[%s3889_s5] ss:$0 sm:$0xff] }
 0x539   : > { %2733 = vpow2.f32 %v1282_v51 }
 0x543   : > { %v2734_v52 = vpop.eup %2733 }
 0x544   : > { %v1287_v53 = vsel %vm1271_vm4, %v2734_v52, 0.0 }
 0x545   : > { %1288 = vadd.xlane.f32.xlu1 %v1287_v53 }
 0x556   : > { %1370 = vrot.lane.b32.xlu1 %v1111_v29, %s3046_s6 }
 0x563   : > { %v1286_v54 = vpop.xlane.xlu0 %1285 }
 0x564   : > { %2735 = vrcp.f32 %v1286_v54 }
 0x567   : > { %v1295_v55 = vpop.permute.xlu0 %1294 }
 0x568   : > { %2487 = vmatpush3.msra.mxu0 %v1295_v55 }
 0x569   : > { %2568 = vmatprep.subr.bf16.mxu0 %v3041_v19 }
 0x56e   : > { %v2736_v58 = vpop.eup %2735 }
 0x56f   : > { %v1292_v60 = vmul.f32 %v2736_v58, %v2732_v47  ;;  %v1736_v47 = vld [vmem:[%s3481_s28 + $0x30] sm:$0xff]  ;;  %s3893_s28 = sld [smem:[#allocation47_spill]] (!%p2408_p9) }
 0x570   : > { %v2590_v49 = vpack.c.bf16 %v1737_v48, %v1736_v47 }
 0x571   : > { %2489 = vmatmul.mubr.msk.f32.vlgmr.msra.gmra.mrb[4].mxu0 %vm1271_vm4, %v1292_v60 }
 0x572   : > { %2570 = vmatpush3.bf16.msra.mxu0 %v2569_v59  ;;  %2500 = vmatprep.mubr.msk.f32.mxu0 %vm3042_vm1, %v3043_v22 }
 0x573   : > { %2574 = vmatprep.subr.bf16.mxu0 %v3041_v19 }
 0x575   : > { %v1939_v38 = vld [vmem:[%s3893_s28] sm:$0x1] (!%p2408_p9) }
 0x5d2   : > { %v1289_v61 = vpop.xlane.xlu1 %1288 }
 0x5d3   : > { %2737 = vrcp.f32 %v1289_v61 }
 0x5d6   : > { %v1371_v62 = vpop.permute.xlu1 %1370 }
 0x5d7   : > { %2492 = vmatpush3.msra.mxu1 %v1371_v62  ;;  %v2404_v62 = vld [vmem:[%s979_s20] ss:$0 sm:$0xff] }
 0x5d8   : > { %2571 = vmatprep.subr.bf16.mxu1 %v3041_v19 }
 0x5dd   : > { %v2738_v1 = vpop.eup %2737 }
 0x5de   : > { %v1293_v3 = vmul.f32 %v2738_v1, %v2734_v52 }
 0x5e0   : > { %2494 = vmatmul.mubr.msk.f32.vlgmr.msra.gmra.mrb[2].mxu1 %vm1271_vm4, %v1293_v3 }
 0x5e1   : > { %2573 = vmatpush3.bf16.msra.mxu1 %v2572_v2  ;;  %2507 = vmatprep.mubr.msk.f32.mxu1 %vm3042_vm1, %v3043_v22 }
 0x5e2   : > { %2580 = vmatprep.subr.bf16.mxu1 %v3041_v19 }
 0x644   : > { %v1366_v4 = vpop.f32.mrb[4].mxu0 }
 0x645   : > { %v2490_v5 = vpop.f32.mrb[5].mxu0  ;;  %2501 = vmatmul.mubr.msk.f32.vlgmr.msra.gmra.mrb[6].mxu0 %vm1114_vm3, %v1366_v4 }
 0x646   : > { %2518 = vmatprep.mubr.msk.f32.mxu0 %vm3042_vm1, %v3043_v22  ;;  %2576 = vmatpush3.bf16.msra.mxu0 %v2575_v26  ;;  %v3049_v26 = vmov (!%p2408_p9), 0.0  }
 0x647   : > { %2577 = vmatprep.subr.bf16.mxu0 %v3041_v19 }
 0x6b3   : > { %v1442_v6 = vpop.f32.mrb[2].mxu1 }
 0x6b4   : > { %v2495_v7 = vpop.f32.mrb[3].mxu1  ;;  %2508 = vmatmul.mubr.msk.f32.vlgmr.msra.gmra.mrb[4].mxu1 %vm1114_vm3, %v1442_v6 }
 0x6b5   : > { %2537 = vmatprep.mubr.msk.f32.mxu1 %vm3042_vm1, %v3043_v22  ;;  %2582 = vmatpush3.bf16.msra.mxu1 %v2581_v40 }
 0x6b6   : > { %2583 = vmatprep.subr.bf16.mxu1 %v3041_v19 }
 0x6b9   : > { %2585 = vmatpush3.bf16.msra.mxu1 %v2584_v43 }
 0x6ba   : > { %2586 = vmatprep.subr.bf16.mxu1 %v3041_v19 }
 0x6bd   : > { %2588 = vmatpush3.bf16.msra.mxu1 %v2587_v46 }
 0x6be   : > { %2589 = vmatprep.subr.bf16.mxu1 %v3041_v19 }
 0x6c1   : > { %2591 = vmatpush3.bf16.msra.mxu1 %v2590_v49 }
 0x718   : > { %v1518_v8 = vpop.f32.mrb[6].mxu0 }
 0x719   : > { %v2502_v9 = vpop.f32.mrb[7].mxu0  ;;  %v1528_v11 = vadd.f32 %v2396_v10, %v1518_v8 }
 0x787   : > { %v1601_v12 = vpop.f32.mrb[4].mxu1 }
 0x788   : > { %v1605_v13 = vadd.f32 %v1601_v12, %v1528_v11  ;;  %v2509_v14 = vpop.f32.mrb[5].mxu1 }
 0x78a   : > { %v1606_v15 = vadd.f32 %v1605_v13, %v3522_v24  ;;  %v1639_v24 = vld [vmem:[%s3471_s22 + $0x10] sm:$0xff]  ;;  %s3887_s22 = scalar_lea.vmem %s3777_s9, %s3439_s15  ;;  %v2406_v13 = vld [vmem:[%s982_s24] ss:$0 sm:$0xff]  ;;  %s3891_s15 = sld [smem:[#allocation46_spill]] (!%p2408_p9) }
 0x78b   : > { %v2578_v28 = vpack.c.bf16 %v1640_v27, %v1639_v24  ;;  %v2401_v35 = vld [vmem:[%s3887_s22] ss:$0 sm:$0xff] }
 0x78c   : > { %v1609_v16 = vsel %vm1035_vm2, %v1606_v15, 0.0 }
 0x78d   : > { %1610 = vadd.xlane.f32.xlu1 %v1609_v16  ;;  %2579 = vmatpush3.bf16.msra.mxu0 %v2578_v28 }
 0x790   : > { %v1935_v27 = vld [vmem:[%s3891_s15] sm:$0xff] (!%p2408_p9)  ;;  %v1936_v28 = vld [vmem:[%s3891_s15 + $0x8] sm:$0xff] (!%p2408_p9) }
 0x81a   : > { %v1611_v17 = vpop.xlane.xlu1 %1610 }
 0x81b   : > { %v1613_v18 = vmul.f32 0.03125, %v1611_v17 }
 0x81d   : > { %v1614_v20 = vsub.f32 %v1606_v15, %v1613_v18  ;;  %v2407_v15 = vld [vmem:[%s985_s10] ss:$0 sm:$0xff]  ;;  %v1854_v18 = vld [vmem:[#allocation8] sm:$0xff] (!%p2408_p9) }
 0x81f   : > { %v1615_v21 = vmul.f32 %v1614_v20, %v1614_v20 }
 0x821   : > { %v1616_v22 = vsel %vm1035_vm2, %v1615_v21, 0.0  ;;  %v1856_v21 = vld [vmem:[#allocation8 + $0x10] sm:$0xff] (!%p2408_p9) }
 0x822   : > { %1617 = vadd.xlane.f32.xlu0 %v1616_v22  ;;  %v3047_v22 = vmov (!%p2408_p9), 0.0|0.0   ;;  %v2596_v24 = vpack.c.bf16 (!%p2408_p9), %v1857_v25, %v1856_v21 }
 0x823   : > { %2592 = vmatprep.subr.bf16.mxu0 (!%p2408_p9), %v3047_v22  ;;  %2598 = vmatprep.subr.bf16.mxu1 (!%p2408_p9), %v3047_v22 }
 0x8af   : > { %v1618_v29 = vpop.xlane.xlu0 %1617 }
 0x8b0   : > { %v1619_v30 = vmul.f32 0.03125, %v1618_v29  ;;  %v2599_v29 = vpack.c.bf16 (!%p2408_p9), %v1936_v28, %v1935_v27 }
 0x8b2   : > { %v1620_v31 = vadd.f32 1e-12, %v1619_v30  ;;  %v1937_v30 = vld [vmem:[%s3891_s15 + $0x10] sm:$0xff] (!%p2408_p9) }
 0x8b4   : > { %2739 = vrsqrt.f32 %v1620_v31  ;;  %v1938_v31 = vld [vmem:[%s3891_s15 + $0x18] sm:$0xff] (!%p2408_p9) }
 0x8be   : > { %v2740_v32 = vpop.eup %2739 }
 0x8bf   : > { %v1622_v34 = vmul.f32 %v2740_v32, %v1614_v20  ;;  %v1855_v20 = vld [vmem:[#allocation8 + $0x8] sm:$0xff] (!%p2408_p9)  ;;  %v2602_v32 = vpack.c.bf16 (!%p2408_p9), %v1938_v31, %v1937_v30 }
 0x8c0   : > { %v2593_v23 = vpack.c.bf16 (!%p2408_p9), %v1855_v20, %v1854_v18 }
 0x8c1   : > { %v1629_v36 = vmul.f32 %v2400_v33, %v1622_v34  ;;  %v1858_v33 = vld [vmem:[%s3892_s17] sm:$0x1] (!%p2408_p9) }
 0x8c3   : > { %v1636_v37 = vadd.f32 %v2401_v35, %v1629_v36 }
 0x8c5   : > { %2519 = vmatmul.mubr.msk.f32.vlgmr.msra.gmra.mrb[8].mxu0 %vm1035_vm2, %v1636_v37 }
 0x8c6   : > { %2548 = vmatprep.mubr.msk.f32.mxu0 (!%p2408_p9), %vm3048_vm6, %v3049_v26  ;;  %2594 = vmatpush3.bf16.msra.mxu0 (!%p2408_p9), %v2593_v23 }
 0x8c7   : > { %2595 = vmatprep.subr.bf16.mxu0 (!%p2408_p9), %v3047_v22 }
 0x8ca   : > { %2597 = vmatpush3.bf16.msra.mxu0 (!%p2408_p9), %v2596_v24 }
 0x998   : > { %v1717_v51 = vpop.f32.mrb[8].mxu0 }
 0x999   : > { %v1718_v52 = vadd.f32 %v2402_v50, %v1717_v51  ;;  %v2520_v53 = vpop.f32.mrb[9].mxu0 }
 0x99b   : > { %v1722_v54 = vmul.f32 0.044715, %v1718_v52  ;;  %v1721_v60 = vmul.f32 0.5, %v1718_v52 }
 0x99d   : > { %v1723_v55 = vmul.f32 %v1722_v54, %v1718_v52 }
 0x99f   : > { %v1724_v56 = vmul.f32 %v1723_v55, %v1718_v52 }
 0x9a1   : > { %v1725_v57 = vadd.f32 %v1724_v56, %v1718_v52 }
 0x9a3   : > { %v1726_v58 = vmul.f32 0.7978846, %v1725_v57 }
 0x9a5   : > { %2741 = vtanh.f32 %v1726_v58 }
 0x9af   : > { %v2742_v59 = vpop.eup %2741 }
 0x9b0   : > { %v1728_v61 = vadd.f32 1.0, %v2742_v59 }
 0x9b2   : > { %v1729_v19 = vmul.f32 %v1728_v61, %v1721_v60 }
 0x9b4   : > { %2538 = vmatmul.mubr.msk.f32.vlgmr.msra.gmra.mrb[6].mxu1 %vm1745_vm5, %v1729_v19 }
 0x9b5   : > { %2559 = vmatprep.mubr.msk.f32.mxu1 (!%p2408_p9), %vm3048_vm6, %v3049_v26  ;;  %2600 = vmatpush3.bf16.msra.mxu1 (!%p2408_p9), %v2599_v29 }
 0x9b6   : > { %2601 = vmatprep.subr.bf16.mxu1 (!%p2408_p9), %v3047_v22 }
 0x9b9   : > { %2603 = vmatpush3.bf16.msra.mxu1 (!%p2408_p9), %v2602_v32 }
 0xa87   : > { %v1815_v63 = vpop.f32.mrb[6].mxu1 }
 0xa88   : > { %v1816_v0 = vadd.f32 %v2404_v62, %v1815_v63  ;;  %v2539_v1 = vpop.f32.mrb[7].mxu1 }
 0xa8a   : > { %v1819_v2 = vadd.f32 %v1816_v0, %v1636_v37 }
 0xa8c   : > { %v1822_v3 = vsel %vm1035_vm2, %v1819_v2, 0.0 }
 0xa8d   : > { %1823 = vadd.xlane.f32.xlu0 %v1822_v3 }
 0xb1a   : > { %v1824_v4 = vpop.xlane.xlu0 %1823 }
 0xb1b   : > { %v1825_v5 = vmul.f32 0.03125, %v1824_v4 }
 0xb1d   : > { %v1826_v6 = vsub.f32 %v1819_v2, %v1825_v5 }
 0xb1f   : > { %v1827_v7 = vmul.f32 %v1826_v6, %v1826_v6 }
 0xb21   : > { %v1828_v8 = vsel %vm1035_vm2, %v1827_v7, 0.0 }
 0xb22   : > { %1829 = vadd.xlane.f32.xlu1 %v1828_v8 }
 0xbaf   : > { %v1830_v9 = vpop.xlane.xlu1 %1829 }
 0xbb0   : > { %v1831_v10 = vmul.f32 0.03125, %v1830_v9 }
 0xbb2   : > { %v1832_v11 = vadd.f32 1e-12, %v1831_v10 }
 0xbb4   : > { %2743 = vrsqrt.f32 %v1832_v11 }
 0xbbe   : > { %v2744_v12 = vpop.eup %2743 }
 0xbbf   : > { %v1834_v14 = vmul.f32 %v2744_v12, %v1826_v6  ;;  %1853 = sbr.rel (%p2408_p9) target bundleno = 3453 (0xd7d), region = 124 }
 0xbc1   : > { %v1841_v16 = vmul.f32 %v2406_v13, %v1834_v14 }
 0xbc3   : > { %v1848_v17 = vadd.f32 %v2407_v15, %v1841_v16 }
 0xbc5   : > { %1849 = vst.msk [vmem:[%s3497_s29] sm:$0xff] %vm1035_vm2, %v1848_v17  ;;  %2549 = vmatmul.mubr.msk.f32.vlgmr.msra.gmra.mrb[0].mxu0 (!%p2408_p9), %vm1035_vm2, %v1848_v17 }
 0xc98   : > { %v1928_v34 = vpop.f32.mrb[0].mxu0 }
 0xc99   : > { %v1929_v35 = vadd.f32 %v1928_v34, %v1858_v33  ;;  %v2550_v36 = vpop.f32.mrb[1].mxu0 }
 0xc9b   : > { %2745 = vtanh.f32 %v1929_v35 }
 0xca5   : > { %v2746_v37 = vpop.eup %2745 }
 0xca6   : > { %1934 = vst.msk [vmem:[%s935_s2] sm:$0x1] %vm1933_vm7, %v2746_v37  ;;  %2560 = vmatmul.mubr.msk.f32.vlgmr.msra.gmra.mrb[0].mxu1 %vm1035_vm2, %v2746_v37 }
 0xd79   : > { %v2009_v39 = vpop.f32.mrb[0].mxu1 }
 0xd7a   : > { %v2010_v40 = vadd.f32 %v2009_v39, %v1939_v38  ;;  %v2561_v41 = vpop.f32.mrb[1].mxu1 }
 0xd7c   : > { %2014 = vst.msk [vmem:[%s941_s11] sm:$0x1] %vm2013_vm8, %v2010_v40 }
 0xd7d PF: > { %s3894_s27 = sld [smem:[#allocation23_spill]]  ;;  %s3895_s20 = sld [smem:[#allocation27_spill]] }
 0xd7e   : > { %s3897_s10 = sld [smem:[#allocation49_spill]]  ;;  %s2050_s24 = sshll.u32 %s935_s2, 4  ;;  %s2051_s24 = int_to_ptr.vmem [resolvable:$true] %s2050_s24 }
 0xd7f   : > { %s2863_s0 = scalar_lea.vmem %s2051_s24, 16  ;;  %s3050_s3 = smov [#allocation11]  }
 0xd80   : > { %p2864_p1 = scmp.ne.s32.totalorder %s2051_s24, %s2863_s0  ;;  %s2867_s19 = sshll.u32 %s3050_s3, 4  ;;  %s2868_s19 = int_to_ptr.vmem [resolvable:$false] %s2867_s19 }
 0xd81   : > { %s2869_s22 = scalar_lea.vmem %s2868_s19, 32  ;;  %p2870_p13 = scmp.lt.s32.totalorder %s2051_s24, %s2868_s19 }
 0xd82   : > { %p2865_p10 = pnand %p2864_p1, %p3309_p6  ;;  %p2871_p5 = scmp.lt.s32.totalorder %s2869_s22, %s2863_s0 }
 0xd83   : > { %s2413_s21 = sshll.u32 %s3894_s27, 4  ;;  %s3898_s25 = sand.u32 1, %s3895_s20  }
 0xd84   : > { %s3660_s30 = scalar_lea.hbm %s3897_s10, %s2413_s21  ;;  %s3666_s4 = scalar_lea.sflag [#allocation12], %s3898_s25 }
 0xd85   : > { %p2866_p8 = pneg %p2865_p10  ;;  %p2872_p4 = por %p2871_p5, %p2870_p13 }
 0xd87   : > { %p2873_p0 = pnand %p2872_p4, %p2866_p8 }
 0xd89   : > { %2876 = shalt.err (!%p2873_p0)
}
 0xd8a   : > { %s2877_s2 = scalar_lea.hbm %s3660_s30, 16  ;;  %s2881_s1 = scalar_lea.hbm %s3897_s10, 32 }
 0xd8b   : > { %p2878_p3 = scmp.ne.s32.totalorder %s3660_s30, %s2877_s2  ;;  %p2882_p11 = scmp.lt.u32.totalorder %s3660_s30, %s3897_s10 }
 0xd8c   : > { %p2883_p2 = scmp.lt.u32.totalorder %s2881_s1, %s2877_s2  ;;  %p2885_p1 = scmp.lt.u32.totalorder %s2877_s2, %s3660_s30 }
 0xd8d   : > { %p2879_p7 = pnand %p2878_p3, %p3309_p6 }
 0xd8e   : > { %p2884_p9 = por %p2883_p2, %p2882_p11 }
 0xd8f   : > { %p2880_p12 = pneg %p2879_p7 }
 0xd90   : > { %p2886_p10 = por %p2885_p1, %p2884_p9 }
 0xd92   : > { %p2887_p8 = pnand %p2886_p10, %p2880_p12 }
 0xd94   : > { %2890 = shalt.err (!%p2887_p8)
}
 0xd95   : > { %2617 = dma.vmem_to_hbm [thread:$0]  (%p3309_p6), %s2051_s24, 16, %s3660_s30, %s3666_s4  }
 0xd96   : > { %s2412_s20 = sshll.u32 %s3894_s27, 7  ;;  %s2037_s18 = sshll.u32 %s3497_s29, 4  ;;  %s2038_s18 = int_to_ptr.vmem [resolvable:$true] %s2037_s18 }
 0xd97   : > { %s3899_s0 = sld [smem:[#allocation48_spill]]  ;;  %s2016_s22 = scalar_lea.sflag [#allocation4], %s3407_s16 }
 0xd98   : > { %s2891_s2 = scalar_lea.vmem %s2038_s18, 128  ;;  %s3051_s23 = smov [#allocation10]  }
 0xd99   : > { %p2892_p13 = scmp.ne.s32.totalorder %s2038_s18, %s2891_s2  ;;  %s2895_s17 = sshll.u32 %s3051_s23, 4  ;;  %s2896_s17 = int_to_ptr.vmem [resolvable:$false] %s2895_s17 }
 0xd9a   : > { %s2897_s1 = scalar_lea.vmem %s2896_s17, 256  ;;  %p2898_p0 = scmp.lt.s32.totalorder %s2038_s18, %s2896_s17 }
 0xd9b   : > { %p2893_p5 = pnand %p2892_p13, %p3309_p6  ;;  %p2899_p3 = scmp.lt.s32.totalorder %s2897_s1, %s2891_s2 }
 0xd9d   : > { %s3900_s19 = smov %s3899_s0  ;;  %s3691_s3 = scalar_lea.hbm %s3899_s0, %s2412_s20 }
 0xd9e   : > { %p2894_p4 = pneg %p2893_p5  ;;  %p2900_p7 = por %p2899_p3, %p2898_p0 }
 0xda0   : > { %p2901_p12 = pnand %p2900_p7, %p2894_p4 }
 0xda2   : > { %2904 = shalt.err (!%p2901_p12)
}
 0xda3   : > { %s2905_s29 = scalar_lea.hbm %s3691_s3, 128  ;;  %s2909_s5 = scalar_lea.hbm %s3900_s19, 256 }
 0xda4   : > { %p2906_p11 = scmp.ne.s32.totalorder %s3691_s3, %s2905_s29  ;;  %p2910_p1 = scmp.lt.u32.totalorder %s3691_s3, %s3900_s19 }
 0xda5   : > { %p2911_p10 = scmp.lt.u32.totalorder %s2909_s5, %s2905_s29  ;;  %p2913_p13 = scmp.lt.u32.totalorder %s2905_s29, %s3691_s3 }
 0xda6   : > { %p2907_p2 = pnand %p2906_p11, %p3309_p6 }
 0xda7   : > { %p2912_p8 = por %p2911_p10, %p2910_p1 }
 0xda8   : > { %p2908_p9 = pneg %p2907_p2 }
 0xda9   : > { %p2914_p5 = por %p2913_p13, %p2912_p8 }
 0xdab   : > { %p2915_p4 = pnand %p2914_p5, %p2908_p9 }
 0xdad   : > { %2918 = shalt.err (!%p2915_p4)
}
 0xdae   : > { %2616 = dma.vmem_to_hbm [thread:$0]  (%p3309_p6), %s2038_s18, 128, %s3691_s3, %s2016_s22  }
 0xdaf   : > { %s3901_s0 = sld [smem:[#allocation50_spill]]  ;;  %s2063_s17 = sshll.u32 %s941_s11, 4  ;;  %s2064_s17 = int_to_ptr.vmem [resolvable:$true] %s2063_s17 }
 0xdb0   : > { %s2919_s1 = scalar_lea.vmem %s2064_s17, 16  ;;  %s3052_s29 = smov [#allocation13]  }
 0xdb1   : > { %p2920_p0 = scmp.ne.s32.totalorder %s2064_s17, %s2919_s1  ;;  %s2923_s30 = sshll.u32 %s3052_s29, 4  ;;  %s2924_s30 = int_to_ptr.vmem [resolvable:$false] %s2923_s30 }
 0xdb2   : > { %s2925_s24 = scalar_lea.vmem %s2924_s30, 32  ;;  %p2926_p12 = scmp.lt.s32.totalorder %s2064_s17, %s2924_s30 }
 0xdb3   : > { %p2921_p3 = pnand %p2920_p0, %p3309_p6  ;;  %p2927_p11 = scmp.lt.s32.totalorder %s2925_s24, %s2919_s1 }
 0xdb5   : > { %s3902_s2 = smov %s3901_s0  ;;  %s3716_s23 = scalar_lea.hbm %s3901_s0, %s2413_s21 }
 0xdb6   : > { %p2922_p7 = pneg %p2921_p3  ;;  %p2928_p2 = por %p2927_p11, %p2926_p12 }
 0xdb8   : > { %p2929_p9 = pnand %p2928_p2, %p2922_p7 }
 0xdba   : > { %2932 = shalt.err (!%p2929_p9)
}
 0xdbb   : > { %s2933_s11 = scalar_lea.hbm %s3716_s23, 16  ;;  %s2937_s21 = scalar_lea.hbm %s3902_s2, 32 }
 0xdbc   : > { %p2934_p1 = scmp.ne.s32.totalorder %s3716_s23, %s2933_s11  ;;  %p2938_p13 = scmp.lt.u32.totalorder %s3716_s23, %s3902_s2 }
 0xdbd   : > { %p2939_p5 = scmp.lt.u32.totalorder %s2937_s21, %s2933_s11  ;;  %p2941_p0 = scmp.lt.u32.totalorder %s2933_s11, %s3716_s23 }
 0xdbe   : > { %p2935_p10 = pnand %p2934_p1, %p3309_p6 }
 0xdbf   : > { %p2940_p4 = por %p2939_p5, %p2938_p13 }
 0xdc0   : > { %p2936_p8 = pneg %p2935_p10 }
 0xdc1   : > { %p2942_p3 = por %p2941_p0, %p2940_p4 }
 0xdc3   : > { %p2943_p7 = pnand %p2942_p3, %p2936_p8 }
 0xdc5   : > { %2946 = shalt.err (!%p2943_p7)
}
 0xdc6   : > { %2618 = dma.vmem_to_hbm [thread:$0]  (%p3309_p6), %s2064_s17, 16, %s3716_s23, %s3666_s4  }
 0xdc7 PF: > { %s3903_s22 = sld [smem:[#allocation26_spill]]  ;;  %s3904_s5 = sld [smem:[#allocation20_spill]] }
 0xdc8   : > { %s3905_s28 = sld [smem:[#allocation28_spill]] }
 0xdcd   : > { %p2651_p12 = scmp.ge.s32.totalorder %s3903_s22, 2  ;;  %s2075_s20 = sand.u32 1, %s3904_s5  }
 0xdce   : > { %p3906_p11 = scmp.ne.s32.totalorder %s3905_s28, 0  ;;  %s2076_s26 = scalar_lea.sflag [#allocation4], %s2075_s20 }
 0xdd0   : > { %p2637_p2 = pnand %p2651_p12, %p3906_p11 }
 0xdd2   : > { %2996 = dma.done.wait (!%p2637_p2), %s2076_s26, 128  }
 0xdd3   : > { %2998 = vsyncadd (!%p2637_p2), %s2076_s26, 4294967168  ;;  %s3907_s25 = sadd.s32 4294967294, %s3903_s22  }
 0xdd4   : > { %s2084_s0 = sand.u32 1, %s3907_s25  }
 0xdd5   : > { %s2085_s1 = scalar_lea.sflag [#allocation12], %s2084_s0 }
 0xdd6   : > { %3000 = dma.done.wait (!%p2637_p2), %s2085_s1, 32  }
 0xdd7   : > { %3002 = vsyncadd (!%p2637_p2), %s2085_s1, 4294967264  ;;  %s46_s1 = sadd.s32 1, %s3903_s22   ;;  %s3908_s3 = sld [smem:[#allocation21_spill]] }
 0xdd8   : > { %p43_p6 = scmp.ge.s32.totalorder %s46_s1, 6   ;;  %s3909_s28 = sld [smem:[#allocation22_spill]] }
 0xdd9   : > { %s3910_s29 = sld [smem:[#allocation32_spill]]  ;;  %s3911_s30 = sld [smem:[#allocation24_spill]] }
 0xdda   : > { %s3912_s4 = sld [smem:[#allocation25_spill]]  ;;  %s3913_s0 = sld [smem:[#allocation29_spill]] }
 0xddb   : > { %s3914_s23 = sld [smem:[#allocation31_spill]]  ;;  %45 = sbr.rel (!%p43_p6) target bundleno = 30 (0x1e), region = 243 }
 0xde2   :  { %2097 = vsyncpa [#allocation3], 1 }
 0xde3   :  { %2099 = vsyncpa [#allocation3 + $0x1], 1 }
 0xde4   :  { %2100 = vsyncpa [#allocation6], 1 }
 0xde5   :  { %2102 = vsyncpa [#allocation6 + $0x1], 1 }
 0xde6   :  { %2103 = vsyncpa [#allocation9], 1 }
 0xde7   :  { %2104 = vsyncpa [#allocation4], 1 }
 0xde8   :  { %2106 = vsyncpa [#allocation4 + $0x1], 1 }
 0xde9   :  { %2107 = vsyncpa [#allocation12], 1 }
 0xdea   :  { %2109 = vsyncpa [#allocation12 + $0x1], 1 }

</bundles_post_ra>
